<compile_context>
chip_gen: v6e
topology: v6e:2x2x1
jax: 0.10.0
libtpu: 0.0.40
codegen_flags: <defaults>
</compile_context>

<pallas_src>
import math
from functools import partial

import jax
import jax.numpy as jnp
import numpy as np
from jax.experimental import pallas as pl
from jax.experimental.pallas import tpu as pltpu


# ---------------------------------------------------------------------------
# In-kernel helpers (f32 math; bf16 only as MXU operands)
# ---------------------------------------------------------------------------

def _layernorm(x, g, b, eps=1e-5):
    mu = jnp.mean(x, axis=-1, keepdims=True)
    var = jnp.mean((x - mu) ** 2, axis=-1, keepdims=True)
    return (x - mu) * jax.lax.rsqrt(var + eps) * g + b


def _mha_core(q, kv, bias, wo, bo, num_heads):
    """Multi-head attention + single fused output projection.

    q:   (Tq, E) f32, already pre-scaled by 1/sqrt(dh) via folded weights.
    kv:  (Tk, 2E) bf16 (K | V fused, VMEM-resident scratch).
    bias:(Tq, Tk) f32 additive (0 keep / -1e9 masked).
    wo:  (E, E) bf16.  bo: (1, E) f32.  Returns (Tq, E) f32.
    """
    Tq, E = q.shape
    dh = E // num_heads
    qb = q.astype(jnp.bfloat16)
    ctx_heads = []
    for h in range(num_heads):                    # static unrolled (small H)
        lo = h * dh
        qh = qb[:, lo:lo + dh]
        kh = kv[:, lo:lo + dh]
        vh = kv[:, E + lo:E + lo + dh]
        # scores = qh @ kh^T without an in-kernel transpose (contract head dim)
        s = jax.lax.dot_general(qh, kh, (((1,), (1,)), ((), ())),
                                preferred_element_type=jnp.float32)
        s = s + bias
        s = s - jnp.max(s, axis=-1, keepdims=True)
        p = jnp.exp(s)
        p = p * pl.reciprocal(jnp.sum(p, axis=-1, keepdims=True), approx=True)
        ctx_heads.append(jnp.dot(p.astype(jnp.bfloat16), vh,
                                 preferred_element_type=jnp.float32))
    ctx = jnp.concatenate(ctx_heads, axis=-1)     # (Tq, E) f32
    out = jnp.dot(ctx.astype(jnp.bfloat16), wo,
                  preferred_element_type=jnp.float32)
    return out + bo


# ---------------------------------------------------------------------------
# Fused decoder-layer kernel.  grid = (B, T // tm)
# ---------------------------------------------------------------------------

def _decoder_layer_kernel(
        x_ref, mem_ref, tbias_ref, sbias_ref,
        ln1_g_ref, ln1_b_ref, sa_wq_ref, sa_bq_ref, sa_wkv_ref, sa_bkv_ref,
        sa_wo_ref, sa_bo_ref,
        ln2_g_ref, ln2_b_ref, ca_wq_ref, ca_bq_ref, ca_wkv_ref, ca_bkv_ref,
        ca_wo_ref, ca_bo_ref,
        ln3_g_ref, ln3_b_ref, ff_w1_ref, ff_b1_ref, ff_w2_ref, ff_b2_ref,
        o_ref,
        kv_self_ref, kv_enc_ref,
        *, num_heads, tm):
    f32 = jnp.float32
    bf16 = jnp.bfloat16
    m = pl.program_id(1)
    E = x_ref.shape[-1]

    ln1_g = ln1_g_ref[...].astype(f32)
    ln1_b = ln1_b_ref[...].astype(f32)

    # --- Once per batch element: K|V for self-attn (full target sequence) and
    # --- enc-attn (memory) into bf16 VMEM scratch, resident across M tiles.
    @pl.when(m == 0)
    def _():
        x_full = x_ref[0].astype(f32)                                  # (T, E)
        x2_full = _layernorm(x_full, ln1_g, ln1_b)
        kv_s = (jnp.dot(x2_full.astype(bf16), sa_wkv_ref[...],
                        preferred_element_type=f32)
                + sa_bkv_ref[...].astype(f32))                          # (T, 2E)
        kv_self_ref[...] = kv_s.astype(bf16)
        mem = mem_ref[0].astype(f32)                                    # (S, E)
        kv_e = (jnp.dot(mem.astype(bf16), ca_wkv_ref[...],
                        preferred_element_type=f32)
                + ca_bkv_ref[...].astype(f32))                          # (S, 2E)
        kv_enc_ref[...] = kv_e.astype(bf16)

    # --- Current query tile ---
    start = pl.multiple_of(m * tm, tm)
    x_t = x_ref[0, pl.ds(start, tm), :].astype(f32)                     # (tm, E)
    tb = tbias_ref[0].astype(f32)                                       # (tm, T)
    sb = sbias_ref[0].astype(f32)                                       # (tm, S)

    # -- block 1: x = x + SelfAttention(LN1(x), LN1(x), LN1(x), target_mask) --
    x2 = _layernorm(x_t, ln1_g, ln1_b)
    q = (jnp.dot(x2.astype(bf16), sa_wq_ref[...], preferred_element_type=f32)
         + sa_bq_ref[...].astype(f32))
    x_t = x_t + _mha_core(q, kv_self_ref[...], tb, sa_wo_ref[...],
                          sa_bo_ref[...].astype(f32), num_heads)

    # -- block 2: x = x + EncoderAttention(LN2(x), memory, memory, src_mask) --
    x2 = _layernorm(x_t, ln2_g_ref[...].astype(f32), ln2_b_ref[...].astype(f32))
    q = (jnp.dot(x2.astype(bf16), ca_wq_ref[...], preferred_element_type=f32)
         + ca_bq_ref[...].astype(f32))
    x_t = x_t + _mha_core(q, kv_enc_ref[...], sb, ca_wo_ref[...],
                          ca_bo_ref[...].astype(f32), num_heads)

    # -- block 3: x = x + FFN(LN3(x)) --
    x2 = _layernorm(x_t, ln3_g_ref[...].astype(f32), ln3_b_ref[...].astype(f32))
    h = jnp.maximum(jnp.dot(x2.astype(bf16), ff_w1_ref[...],
                            preferred_element_type=f32)
                    + ff_b1_ref[...].astype(f32), 0.0)
    x_t = x_t + (jnp.dot(h.astype(bf16), ff_w2_ref[...],
                         preferred_element_type=f32)
                 + ff_b2_ref[...].astype(f32))

    o_ref[0] = x_t.astype(o_ref.dtype)


# ---------------------------------------------------------------------------
# Wrapper: weight fusion, bf16 casts, specs, pallas_call
# ---------------------------------------------------------------------------

def old_decoder_layer(params, x, memory, source_mask, target_mask, num_heads):
    B, T, E = x.shape
    S = memory.shape[1]
    F = params["ff_w1"].shape[1]
    dh = E // num_heads
    scale = 1.0 / math.sqrt(dh)
    bf16 = jnp.bfloat16

    sa = params["self_attn"]
    ca = params["enc_attn"]

    # bf16 matmul weights; 1/sqrt(dh) folded into Q weight + bias.
    sa_wq = (sa["wq"] * scale).astype(bf16)
    sa_bq = (sa["bq"] * scale).reshape(1, E)
    sa_wkv = jnp.concatenate([sa["wk"], sa["wv"]], axis=1).astype(bf16)
    sa_bkv = jnp.concatenate([sa["bk"], sa["bv"]]).reshape(1, 2 * E)
    sa_wo = sa["wo"].astype(bf16)
    sa_bo = sa["bo"].reshape(1, E)

    ca_wq = (ca["wq"] * scale).astype(bf16)
    ca_bq = (ca["bq"] * scale).reshape(1, E)
    ca_wkv = jnp.concatenate([ca["wk"], ca["wv"]], axis=1).astype(bf16)
    ca_bkv = jnp.concatenate([ca["bk"], ca["bv"]]).reshape(1, 2 * E)
    ca_wo = ca["wo"].astype(bf16)
    ca_bo = ca["bo"].reshape(1, E)

    ff_w1 = params["ff_w1"].astype(bf16)
    ff_b1 = params["ff_b1"].reshape(1, F)
    ff_w2 = params["ff_w2"].astype(bf16)
    ff_b2 = params["ff_b2"].reshape(1, E)

    # masked_fill(mask == 0, -1e9) -> additive bf16 bias (halves mask DMA).
    # TODO(synk): when the target mask is known-causal, generate it in-kernel
    #   with broadcasted_iota and drop this input entirely.
    tbias = ((target_mask.astype(jnp.float32) - 1.0) * 1e9).astype(bf16)
    sbias = ((source_mask.astype(jnp.float32) - 1.0) * 1e9).astype(bf16)

    # Query-sequence tile (multiple of 8, capped at 256 for v7x VMEM).
    tm = T
    for cand in (256, 128, 64, 32, 16, 8):
        if T % cand == 0:
            tm = cand
            break
    n_m = T // tm

    # Single-buffered, VMEM-resident weight blocks (constant index_map).
    def wspec(shape):
        imap = lambda b, m: tuple(0 for _ in shape)
        if hasattr(pl, "Buffered"):
            try:
                return pl.BlockSpec(shape, imap, pipeline_mode=pl.Buffered(1))
            except Exception:
                pass
        return pl.BlockSpec(shape, imap)

    in_specs = [
        pl.BlockSpec((1, T, E), lambda b, m: (b, 0, 0)),      # x (full seq, resident over m)
        pl.BlockSpec((1, S, E), lambda b, m: (b, 0, 0)),      # memory
        pl.BlockSpec((1, tm, T), lambda b, m: (b, m, 0)),     # target-mask bias tile
        pl.BlockSpec((1, tm, S), lambda b, m: (b, m, 0)),     # source-mask bias tile
        wspec((1, E)), wspec((1, E)),                         # ln1 gamma / beta
        wspec((E, E)), wspec((1, E)),                         # self-attn Q proj (scaled)
        wspec((E, 2 * E)), wspec((1, 2 * E)),                 # self-attn fused K|V
        wspec((E, E)), wspec((1, E)),                         # self-attn out proj
        wspec((1, E)), wspec((1, E)),                         # ln2 gamma / beta
        wspec((E, E)), wspec((1, E)),                         # enc-attn Q proj (scaled)
        wspec((E, 2 * E)), wspec((1, 2 * E)),                 # enc-attn fused K|V
        wspec((E, E)), wspec((1, E)),                         # enc-attn out proj
        wspec((1, E)), wspec((1, E)),                         # ln3 gamma / beta
        wspec((E, F)), wspec((1, F)),                         # ffn w1 / b1
        wspec((F, E)), wspec((1, E)),                         # ffn w2 / b2
    ]

    operands = (x, memory, tbias, sbias,
                params["ln1_g"].reshape(1, E), params["ln1_b"].reshape(1, E),
                sa_wq, sa_bq, sa_wkv, sa_bkv, sa_wo, sa_bo,
                params["ln2_g"].reshape(1, E), params["ln2_b"].reshape(1, E),
                ca_wq, ca_bq, ca_wkv, ca_bkv, ca_wo, ca_bo,
                params["ln3_g"].reshape(1, E), params["ln3_b"].reshape(1, E),
                ff_w1, ff_b1, ff_w2, ff_b2)

    # VMEM budget from the actual resident footprint (weights single-buffered,
    # x/mem/mask/output double-buffered, K|V scratch, activation headroom).
    f32sz, bf16sz = 4, 2
    weight_bytes = (bf16sz * (4 * E * E + 2 * E * 2 * E + 2 * E * F)
                    + f32sz * (16 * E + F))
    act_bytes = (f32sz * (T + S) * E
                 + bf16sz * tm * (T + S)
                 + x.dtype.itemsize * tm * E)
    scratch_bytes = bf16sz * 2 * E * (T + S)
    interm_bytes = f32sz * (6 * tm * max(T, S) + 2 * tm * F + 10 * tm * E)
    vmem_limit = int(weight_bytes + 2 * act_bytes + scratch_bytes
                     + interm_bytes + (4 << 20))
    vmem_limit = max(32 << 20, min(vmem_limit, 64 << 20))

    flops = 2 * B * (
        T * E * E + T * E * 2 * E + 2 * T * T * E + T * E * E   # self-attn
        + T * E * E + S * E * 2 * E + 2 * T * S * E + T * E * E  # enc-attn
        + 2 * T * E * F)                                          # ffn
    transcendentals = B * num_heads * (T * T + T * S)
    bytes_accessed = int(sum(int(np.prod(a.shape)) * a.dtype.itemsize
                             for a in operands)
                         + B * T * E * x.dtype.itemsize)

    return pl.pallas_call(
        partial(_decoder_layer_kernel, num_heads=num_heads, tm=tm),
        out_shape=jax.ShapeDtypeStruct((B, T, E), x.dtype),
        grid=(B, n_m),
        in_specs=in_specs,
        out_specs=pl.BlockSpec((1, tm, E), lambda b, m: (b, m, 0)),
        scratch_shapes=[
            pltpu.VMEM((T, 2 * E), jnp.bfloat16),   # self-attn K|V (full tgt seq)
            pltpu.VMEM((S, 2 * E), jnp.bfloat16),   # enc-attn K|V (memory)
        ],
        compiler_params=pltpu.CompilerParams(
            dimension_semantics=("parallel", "arbitrary"),
            vmem_limit_bytes=vmem_limit),
        cost_estimate=pl.CostEstimate(
            flops=int(flops),
            transcendentals=int(transcendentals),
            bytes_accessed=bytes_accessed),
    )(*operands)


# ---------------------------------------------------------------------------
# Pure-JAX f32 reference (matches the PyTorch module semantics exactly)
# ---------------------------------------------------------------------------

def _ref_mha(p, query, key, value, mask, num_heads):
    B, Tq, E = query.shape
    Tk = key.shape[1]
    dh = E // num_heads
    q = (query.reshape(B * Tq, E) @ p["wq"] + p["bq"]).reshape(B, Tq, num_heads, dh).transpose(0, 2, 1, 3)
    k = (key.reshape(B * Tk, E) @ p["wk"] + p["bk"]).reshape(B, Tk, num_heads, dh).transpose(0, 2, 1, 3)
    v = (value.reshape(B * Tk, E) @ p["wv"] + p["bv"]).reshape(B, Tk, num_heads, dh).transpose(0, 2, 1, 3)
    s = jnp.einsum("bhqd,bhkd->bhqk", q / math.sqrt(dh), k)
    s = jnp.where(mask[:, None] == 0, -1e9, s)
    a = jax.nn.softmax(s, axis=-1)
    o = jnp.einsum("bhqk,bhkd->bhqd", a, v).transpose(0, 2, 1, 3).reshape(B * Tq, E)
    return (o @ p["wo"] + p["bo"]).reshape(B, Tq, E)


def _ref_ln(x, g, b):
    mu = jnp.mean(x, axis=-1, keepdims=True)
    var = jnp.mean((x - mu) ** 2, axis=-1, keepdims=True)
    return (x - mu) / jnp.sqrt(var + 1e-5) * g + b


def _ref_decoder(params, x, memory, source_mask, target_mask, num_heads):
    x2 = _ref_ln(x, params["ln1_g"], params["ln1_b"])
    x = x + _ref_mha(params["self_attn"], x2, x2, x2, target_mask, num_heads)
    x2 = _ref_ln(x, params["ln2_g"], params["ln2_b"])
    x = x + _ref_mha(params["enc_attn"], x2, memory, memory, source_mask, num_heads)
    x2 = _ref_ln(x, params["ln3_g"], params["ln3_b"])
    h = jnp.maximum(x2 @ params["ff_w1"] + params["ff_b1"], 0.0)
    x = x + (h @ params["ff_w2"] + params["ff_b2"])
    return x


# ---------------------------------------------------------------------------
# Parameter init + driver
# ---------------------------------------------------------------------------

def _init_params(key, E, H, F):
    ks = jax.random.split(key, 12)

    def mha_params(k4):
        a, b, c, d = jax.random.split(k4, 4)
        return {
            "wq": jax.random.normal(a, (E, E), jnp.float32) * 0.1,
            "bq": jnp.zeros((E,), jnp.float32),
            "wk": jax.random.normal(b, (E, E), jnp.float32) * 0.1,
            "bk": jnp.zeros((E,), jnp.float32),
            "wv": jax.random.normal(c, (E, E), jnp.float32) * 0.1,
            "bv": jnp.zeros((E,), jnp.float32),
            "wo": jax.random.normal(d, (E, E), jnp.float32) * 0.1,
            "bo": jnp.zeros((E,), jnp.float32),
        }

    return {
        "self_attn": mha_params(ks[0]),
        "enc_attn": mha_params(ks[1]),
        "ff_w1": jax.random.normal(ks[2], (E, F), jnp.float32) * 0.1,
        "ff_b1": jnp.zeros((F,), jnp.float32),
        "ff_w2": jax.random.normal(ks[3], (F, E), jnp.float32) * 0.1,
        "ff_b2": jnp.zeros((E,), jnp.float32),
        "ln1_g": jnp.ones((E,), jnp.float32), "ln1_b": jnp.zeros((E,), jnp.float32),
        "ln2_g": jnp.ones((E,), jnp.float32), "ln2_b": jnp.zeros((E,), jnp.float32),
        "ln3_g": jnp.ones((E,), jnp.float32), "ln3_b": jnp.zeros((E,), jnp.float32),
    }


if __name__ == "__main__":
    B, T, S, E, H, F = 2, 8, 8, 32, 4, 64  # batch, tgt seq, src seq, embed, heads, ff_dim

    key = jax.random.PRNGKey(0)
    kx, km, kp = jax.random.split(key, 3)

    x = jax.random.normal(kx, (B, T, E), jnp.float32)
    memory = jax.random.normal(km, (B, S, E), jnp.float32)
    # target mask: causal; source mask: all-visible (1 = keep, 0 = masked)
    target_mask = jnp.tril(jnp.ones((T, T), jnp.float32))[None].repeat(B, axis=0)
    source_mask = jnp.ones((B, T, S), jnp.float32)

    params = _init_params(kp, E, H, F)

    run = jax.jit(partial(old_decoder_layer, num_heads=H))
    out = run(params, x, memory, source_mask, target_mask)
    out = jax.block_until_ready(out)

    ref = _ref_decoder(params, x, memory, source_mask, target_mask, H)
    # Loosened tolerance: bf16 MXU operands + approx-reciprocal softmax +
    # additive-bias masking vs. an all-f32 reference.
    np.testing.assert_allclose(np.asarray(out), np.asarray(ref), rtol=5e-2, atol=5e-2)

    print("KERNEL_OK")
</pallas_src>

<mosaic_0001>
module attributes {stable_mosaic.version = 11 : i64} {
  func.func @_decoder_layer_kernel(%arg0: i32, %arg1: i32, %arg2: memref<1x8x32xf32, #tpu.memory_space<vmem>>, %arg3: memref<1x8x32xf32, #tpu.memory_space<vmem>>, %arg4: memref<1x8x8xbf16, #tpu.memory_space<vmem>>, %arg5: memref<1x8x8xbf16, #tpu.memory_space<vmem>>, %arg6: memref<1x32xf32, #tpu.memory_space<vmem>>, %arg7: memref<1x32xf32, #tpu.memory_space<vmem>>, %arg8: memref<32x32xbf16, #tpu.memory_space<vmem>>, %arg9: memref<1x32xf32, #tpu.memory_space<vmem>>, %arg10: memref<32x64xbf16, #tpu.memory_space<vmem>>, %arg11: memref<1x64xf32, #tpu.memory_space<vmem>>, %arg12: memref<32x32xbf16, #tpu.memory_space<vmem>>, %arg13: memref<1x32xf32, #tpu.memory_space<vmem>>, %arg14: memref<1x32xf32, #tpu.memory_space<vmem>>, %arg15: memref<1x32xf32, #tpu.memory_space<vmem>>, %arg16: memref<32x32xbf16, #tpu.memory_space<vmem>>, %arg17: memref<1x32xf32, #tpu.memory_space<vmem>>, %arg18: memref<32x64xbf16, #tpu.memory_space<vmem>>, %arg19: memref<1x64xf32, #tpu.memory_space<vmem>>, %arg20: memref<32x32xbf16, #tpu.memory_space<vmem>>, %arg21: memref<1x32xf32, #tpu.memory_space<vmem>>, %arg22: memref<1x32xf32, #tpu.memory_space<vmem>>, %arg23: memref<1x32xf32, #tpu.memory_space<vmem>>, %arg24: memref<32x64xbf16, #tpu.memory_space<vmem>>, %arg25: memref<1x64xf32, #tpu.memory_space<vmem>>, %arg26: memref<64x32xbf16, #tpu.memory_space<vmem>>, %arg27: memref<1x32xf32, #tpu.memory_space<vmem>>, %arg28: memref<1x8x32xf32, #tpu.memory_space<vmem>>, %arg29: memref<8x64xbf16, #tpu.memory_space<vmem>>, %arg30: memref<8x64xbf16, #tpu.memory_space<vmem>>) attributes {dimension_semantics = [#tpu.dimension_semantics<parallel>, #tpu.dimension_semantics<arbitrary>], iteration_bounds = array<i64: 2, 1>, scalar_prefetch = 0 : i64, scratch_operands = 2 : i64, tpu.core_type = #tpu.core_type<tc>, window_params = [{transform_indices = @transform_0, window_bounds = array<i64: 1, 8, 32>}, {transform_indices = @transform_1, window_bounds = array<i64: 1, 8, 32>}, {transform_indices = @transform_2, window_bounds = array<i64: 1, 8, 8>}, {transform_indices = @transform_3, window_bounds = array<i64: 1, 8, 8>}, {pipeline_mode = #tpu.pipeline_mode<synchronous>, transform_indices = @transform_4, window_bounds = array<i64: 1, 32>}, {pipeline_mode = #tpu.pipeline_mode<synchronous>, transform_indices = @transform_5, window_bounds = array<i64: 1, 32>}, {pipeline_mode = #tpu.pipeline_mode<synchronous>, transform_indices = @transform_6, window_bounds = array<i64: 32, 32>}, {pipeline_mode = #tpu.pipeline_mode<synchronous>, transform_indices = @transform_7, window_bounds = array<i64: 1, 32>}, {pipeline_mode = #tpu.pipeline_mode<synchronous>, transform_indices = @transform_8, window_bounds = array<i64: 32, 64>}, {pipeline_mode = #tpu.pipeline_mode<synchronous>, transform_indices = @transform_9, window_bounds = array<i64: 1, 64>}, {pipeline_mode = #tpu.pipeline_mode<synchronous>, transform_indices = @transform_10, window_bounds = array<i64: 32, 32>}, {pipeline_mode = #tpu.pipeline_mode<synchronous>, transform_indices = @transform_11, window_bounds = array<i64: 1, 32>}, {pipeline_mode = #tpu.pipeline_mode<synchronous>, transform_indices = @transform_12, window_bounds = array<i64: 1, 32>}, {pipeline_mode = #tpu.pipeline_mode<synchronous>, transform_indices = @transform_13, window_bounds = array<i64: 1, 32>}, {pipeline_mode = #tpu.pipeline_mode<synchronous>, transform_indices = @transform_14, window_bounds = array<i64: 32, 32>}, {pipeline_mode = #tpu.pipeline_mode<synchronous>, transform_indices = @transform_15, window_bounds = array<i64: 1, 32>}, {pipeline_mode = #tpu.pipeline_mode<synchronous>, transform_indices = @transform_16, window_bounds = array<i64: 32, 64>}, {pipeline_mode = #tpu.pipeline_mode<synchronous>, transform_indices = @transform_17, window_bounds = array<i64: 1, 64>}, {pipeline_mode = #tpu.pipeline_mode<synchronous>, transform_indices = @transform_18, window_bounds = array<i64: 32, 32>}, {pipeline_mode = #tpu.pipeline_mode<synchronous>, transform_indices = @transform_19, window_bounds = array<i64: 1, 32>}, {pipeline_mode = #tpu.pipeline_mode<synchronous>, transform_indices = @transform_20, window_bounds = array<i64: 1, 32>}, {pipeline_mode = #tpu.pipeline_mode<synchronous>, transform_indices = @transform_21, window_bounds = array<i64: 1, 32>}, {pipeline_mode = #tpu.pipeline_mode<synchronous>, transform_indices = @transform_22, window_bounds = array<i64: 32, 64>}, {pipeline_mode = #tpu.pipeline_mode<synchronous>, transform_indices = @transform_23, window_bounds = array<i64: 1, 64>}, {pipeline_mode = #tpu.pipeline_mode<synchronous>, transform_indices = @transform_24, window_bounds = array<i64: 64, 32>}, {pipeline_mode = #tpu.pipeline_mode<synchronous>, transform_indices = @transform_25, window_bounds = array<i64: 1, 32>}, {transform_indices = @transform_26, window_bounds = array<i64: 1, 8, 32>}]} {
    %c0 = arith.constant 0 : index
    %c0_0 = arith.constant 0 : index
    %0 = vector.load %arg6[%c0, %c0_0] : memref<1x32xf32, #tpu.memory_space<vmem>>, vector<1x32xf32>
    %c0_1 = arith.constant 0 : index
    %c0_2 = arith.constant 0 : index
    %1 = vector.load %arg7[%c0_1, %c0_2] : memref<1x32xf32, #tpu.memory_space<vmem>>, vector<1x32xf32>
    %c0_i32 = arith.constant 0 : i32
    %2 = arith.cmpi eq, %arg1, %c0_i32 : i32
    %3 = arith.extui %2 : i1 to i32
    %c0_i32_3 = arith.constant 0 : i32
    %4 = arith.cmpi ne, %3, %c0_i32_3 : i32
    scf.if %4 {
      %c0_104 = arith.constant 0 : index
      %c0_105 = arith.constant 0 : index
      %c0_106 = arith.constant 0 : index
      %272 = vector.load %arg2[%c0_104, %c0_105, %c0_106] : memref<1x8x32xf32, #tpu.memory_space<vmem>>, vector<1x8x32xf32>
      %273 = vector.shape_cast %272 : vector<1x8x32xf32> to vector<8x32xf32>
      %cst_107 = arith.constant dense<0.000000e+00> : vector<8xf32>
      %274 = vector.multi_reduction <add>, %273, %cst_107 [1] : vector<8x32xf32> to vector<8xf32>
      %275 = vector.shape_cast %274 : vector<8xf32> to vector<8x1xf32>
      %cst_108 = arith.constant 3.200000e+01 : f32
      %276 = vector.broadcast %cst_108 : f32 to vector<8x1xf32>
      %277 = arith.divf %275, %276 : vector<8x1xf32>
      %278 = vector.broadcast %277 : vector<8x1xf32> to vector<8x32xf32>
      %279 = arith.subf %273, %278 : vector<8x32xf32>
      %280 = arith.mulf %279, %279 : vector<8x32xf32>
      %cst_109 = arith.constant dense<0.000000e+00> : vector<8xf32>
      %281 = vector.multi_reduction <add>, %280, %cst_109 [1] : vector<8x32xf32> to vector<8xf32>
      %282 = vector.shape_cast %281 : vector<8xf32> to vector<8x1xf32>
      %cst_110 = arith.constant 3.200000e+01 : f32
      %283 = vector.broadcast %cst_110 : f32 to vector<8x1xf32>
      %284 = arith.divf %282, %283 : vector<8x1xf32>
      %285 = vector.broadcast %277 : vector<8x1xf32> to vector<8x32xf32>
      %286 = arith.subf %273, %285 : vector<8x32xf32>
      %cst_111 = arith.constant 9.99999974E-6 : f32
      %287 = vector.broadcast %cst_111 : f32 to vector<8x1xf32>
      %288 = arith.addf %284, %287 : vector<8x1xf32>
      %289 = math.rsqrt %288 : vector<8x1xf32>
      %290 = vector.broadcast %289 : vector<8x1xf32> to vector<8x32xf32>
      %291 = arith.mulf %286, %290 : vector<8x32xf32>
      %292 = vector.broadcast %0 : vector<1x32xf32> to vector<8x32xf32>
      %293 = arith.mulf %291, %292 : vector<8x32xf32>
      %294 = vector.broadcast %1 : vector<1x32xf32> to vector<8x32xf32>
      %295 = arith.addf %293, %294 : vector<8x32xf32>
      %296 = arith.truncf %295 : vector<8x32xf32> to vector<8x32xbf16>
      %c0_112 = arith.constant 0 : index
      %c0_113 = arith.constant 0 : index
      %297 = vector.load %arg10[%c0_112, %c0_113] : memref<32x64xbf16, #tpu.memory_space<vmem>>, vector<32x64xbf16>
      %cst_114 = arith.constant dense<0.000000e+00> : vector<8x64xf32>
      %298 = tpu.matmul %296, %297, %cst_114 {dimension_numbers = #tpu.dot_dimension_numbers<[1], [0], [0], [1], [0, 0, 1, 1], [], []>} : vector<8x32xbf16>, vector<32x64xbf16>, vector<8x64xf32> -> vector<8x64xf32>
      %c0_115 = arith.constant 0 : index
      %c0_116 = arith.constant 0 : index
      %299 = vector.load %arg11[%c0_115, %c0_116] : memref<1x64xf32, #tpu.memory_space<vmem>>, vector<1x64xf32>
      %300 = vector.broadcast %299 : vector<1x64xf32> to vector<8x64xf32>
      %301 = arith.addf %298, %300 : vector<8x64xf32>
      %302 = arith.truncf %301 : vector<8x64xf32> to vector<8x64xbf16>
      %c0_117 = arith.constant 0 : index
      %c0_118 = arith.constant 0 : index
      %303 = vector.load %arg29[%c0_117, %c0_118] : memref<8x64xbf16, #tpu.memory_space<vmem>>, vector<8x64xbf16>
      tpu.vector_store %arg29[%c0_117, %c0_118], %302 {strides = array<i32>} : memref<8x64xbf16, #tpu.memory_space<vmem>>, vector<8x64xbf16>,
      %c0_119 = arith.constant 0 : index
      %c0_120 = arith.constant 0 : index
      %c0_121 = arith.constant 0 : index
      %304 = vector.load %arg3[%c0_119, %c0_120, %c0_121] : memref<1x8x32xf32, #tpu.memory_space<vmem>>, vector<1x8x32xf32>
      %305 = vector.shape_cast %304 : vector<1x8x32xf32> to vector<8x32xf32>
      %306 = arith.truncf %305 : vector<8x32xf32> to vector<8x32xbf16>
      %c0_122 = arith.constant 0 : index
      %c0_123 = arith.constant 0 : index
      %307 = vector.load %arg18[%c0_122, %c0_123] : memref<32x64xbf16, #tpu.memory_space<vmem>>, vector<32x64xbf16>
      %cst_124 = arith.constant dense<0.000000e+00> : vector<8x64xf32>
      %308 = tpu.matmul %306, %307, %cst_124 {dimension_numbers = #tpu.dot_dimension_numbers<[1], [0], [0], [1], [0, 0, 1, 1], [], []>} : vector<8x32xbf16>, vector<32x64xbf16>, vector<8x64xf32> -> vector<8x64xf32>
      %c0_125 = arith.constant 0 : index
      %c0_126 = arith.constant 0 : index
      %309 = vector.load %arg19[%c0_125, %c0_126] : memref<1x64xf32, #tpu.memory_space<vmem>>, vector<1x64xf32>
      %310 = vector.broadcast %309 : vector<1x64xf32> to vector<8x64xf32>
      %311 = arith.addf %308, %310 : vector<8x64xf32>
      %312 = arith.truncf %311 : vector<8x64xf32> to vector<8x64xbf16>
      %c0_127 = arith.constant 0 : index
      %c0_128 = arith.constant 0 : index
      %313 = vector.load %arg30[%c0_127, %c0_128] : memref<8x64xbf16, #tpu.memory_space<vmem>>, vector<8x64xbf16>
      tpu.vector_store %arg30[%c0_127, %c0_128], %312 {strides = array<i32>} : memref<8x64xbf16, #tpu.memory_space<vmem>>, vector<8x64xbf16>,
    } else {
    }
    %c8_i32 = arith.constant 8 : i32
    %5 = arith.muli %arg1, %c8_i32 : i32
    %6 = tpu.assume_multiple %5, 8 : i32
    %c0_4 = arith.constant 0 : index
    %7 = arith.index_cast %6 : i32 to index
    %c0_5 = arith.constant 0 : index
    %8 = vector.load %arg2[%c0_4, %7, %c0_5] : memref<1x8x32xf32, #tpu.memory_space<vmem>>, vector<1x8x32xf32>
    %9 = vector.shape_cast %8 : vector<1x8x32xf32> to vector<8x32xf32>
    %c0_6 = arith.constant 0 : index
    %c0_7 = arith.constant 0 : index
    %c0_8 = arith.constant 0 : index
    %10 = vector.load %arg4[%c0_6, %c0_7, %c0_8] : memref<1x8x8xbf16, #tpu.memory_space<vmem>>, vector<1x8x8xbf16>
    %11 = vector.shape_cast %10 : vector<1x8x8xbf16> to vector<8x8xbf16>
    %12 = arith.extf %11 : vector<8x8xbf16> to vector<8x8xf32>
    %c0_9 = arith.constant 0 : index
    %c0_10 = arith.constant 0 : index
    %c0_11 = arith.constant 0 : index
    %13 = vector.load %arg5[%c0_9, %c0_10, %c0_11] : memref<1x8x8xbf16, #tpu.memory_space<vmem>>, vector<1x8x8xbf16>
    %14 = vector.shape_cast %13 : vector<1x8x8xbf16> to vector<8x8xbf16>
    %15 = arith.extf %14 : vector<8x8xbf16> to vector<8x8xf32>
    %cst = arith.constant dense<0.000000e+00> : vector<8xf32>
    %16 = vector.multi_reduction <add>, %9, %cst [1] : vector<8x32xf32> to vector<8xf32>
    %17 = vector.shape_cast %16 : vector<8xf32> to vector<8x1xf32>
    %cst_12 = arith.constant 3.200000e+01 : f32
    %18 = vector.broadcast %cst_12 : f32 to vector<8x1xf32>
    %19 = arith.divf %17, %18 : vector<8x1xf32>
    %20 = vector.broadcast %19 : vector<8x1xf32> to vector<8x32xf32>
    %21 = arith.subf %9, %20 : vector<8x32xf32>
    %22 = arith.mulf %21, %21 : vector<8x32xf32>
    %cst_13 = arith.constant dense<0.000000e+00> : vector<8xf32>
    %23 = vector.multi_reduction <add>, %22, %cst_13 [1] : vector<8x32xf32> to vector<8xf32>
    %24 = vector.shape_cast %23 : vector<8xf32> to vector<8x1xf32>
    %cst_14 = arith.constant 3.200000e+01 : f32
    %25 = vector.broadcast %cst_14 : f32 to vector<8x1xf32>
    %26 = arith.divf %24, %25 : vector<8x1xf32>
    %27 = vector.broadcast %19 : vector<8x1xf32> to vector<8x32xf32>
    %28 = arith.subf %9, %27 : vector<8x32xf32>
    %cst_15 = arith.constant 9.99999974E-6 : f32
    %29 = vector.broadcast %cst_15 : f32 to vector<8x1xf32>
    %30 = arith.addf %26, %29 : vector<8x1xf32>
    %31 = math.rsqrt %30 : vector<8x1xf32>
    %32 = vector.broadcast %31 : vector<8x1xf32> to vector<8x32xf32>
    %33 = arith.mulf %28, %32 : vector<8x32xf32>
    %34 = vector.broadcast %0 : vector<1x32xf32> to vector<8x32xf32>
    %35 = arith.mulf %33, %34 : vector<8x32xf32>
    %36 = vector.broadcast %1 : vector<1x32xf32> to vector<8x32xf32>
    %37 = arith.addf %35, %36 : vector<8x32xf32>
    %38 = arith.truncf %37 : vector<8x32xf32> to vector<8x32xbf16>
    %c0_16 = arith.constant 0 : index
    %c0_17 = arith.constant 0 : index
    %39 = vector.load %arg8[%c0_16, %c0_17] : memref<32x32xbf16, #tpu.memory_space<vmem>>, vector<32x32xbf16>
    %cst_18 = arith.constant dense<0.000000e+00> : vector<8x32xf32>
    %40 = tpu.matmul %38, %39, %cst_18 {dimension_numbers = #tpu.dot_dimension_numbers<[1], [0], [0], [1], [0, 0, 1, 1], [], []>} : vector<8x32xbf16>, vector<32x32xbf16>, vector<8x32xf32> -> vector<8x32xf32>
    %c0_19 = arith.constant 0 : index
    %c0_20 = arith.constant 0 : index
    %41 = vector.load %arg9[%c0_19, %c0_20] : memref<1x32xf32, #tpu.memory_space<vmem>>, vector<1x32xf32>
    %42 = vector.broadcast %41 : vector<1x32xf32> to vector<8x32xf32>
    %43 = arith.addf %40, %42 : vector<8x32xf32>
    %c0_21 = arith.constant 0 : index
    %c0_22 = arith.constant 0 : index
    %44 = vector.load %arg29[%c0_21, %c0_22] : memref<8x64xbf16, #tpu.memory_space<vmem>>, vector<8x64xbf16>
    %c0_23 = arith.constant 0 : index
    %c0_24 = arith.constant 0 : index
    %45 = vector.load %arg12[%c0_23, %c0_24] : memref<32x32xbf16, #tpu.memory_space<vmem>>, vector<32x32xbf16>
    %c0_25 = arith.constant 0 : index
    %c0_26 = arith.constant 0 : index
    %46 = vector.load %arg13[%c0_25, %c0_26] : memref<1x32xf32, #tpu.memory_space<vmem>>, vector<1x32xf32>
    %47 = arith.truncf %43 : vector<8x32xf32> to vector<8x32xbf16>
    %48 = vector.extract_strided_slice %47 {offsets = [0, 0], sizes = [8, 8], strides = [1, 1]} : vector<8x32xbf16> to vector<8x8xbf16>
    %49 = vector.extract_strided_slice %44 {offsets = [0, 0], sizes = [8, 8], strides = [1, 1]} : vector<8x64xbf16> to vector<8x8xbf16>
    %50 = vector.extract_strided_slice %44 {offsets = [0, 32], sizes = [8, 8], strides = [1, 1]} : vector<8x64xbf16> to vector<8x8xbf16>
    %cst_27 = arith.constant dense<0.000000e+00> : vector<8x8xf32>
    %51 = tpu.matmul %48, %49, %cst_27 {dimension_numbers = #tpu.dot_dimension_numbers<[1], [1], [0], [0], [0, 0, 1, 0], [], []>} : vector<8x8xbf16>, vector<8x8xbf16>, vector<8x8xf32> -> vector<8x8xf32>
    %52 = arith.addf %51, %12 : vector<8x8xf32>
    %cst_28 = arith.constant dense<0xFF800000> : vector<8xf32>
    %53 = vector.multi_reduction <maximumf>, %52, %cst_28 [1] : vector<8x8xf32> to vector<8xf32>
    %54 = vector.shape_cast %53 : vector<8xf32> to vector<8x1xf32>
    %55 = vector.broadcast %54 : vector<8x1xf32> to vector<8x8xf32>
    %56 = arith.subf %52, %55 : vector<8x8xf32>
    %57 = math.exp %56 : vector<8x8xf32>
    %cst_29 = arith.constant dense<0.000000e+00> : vector<8xf32>
    %58 = vector.multi_reduction <add>, %57, %cst_29 [1] : vector<8x8xf32> to vector<8xf32>
    %59 = vector.shape_cast %58 : vector<8xf32> to vector<8x1xf32>
    %60 = tpu.reciprocal %59 {approx = true} : vector<8x1xf32> -> vector<8x1xf32>
    %61 = vector.broadcast %60 : vector<8x1xf32> to vector<8x8xf32>
    %62 = arith.mulf %57, %61 : vector<8x8xf32>
    %63 = arith.truncf %62 : vector<8x8xf32> to vector<8x8xbf16>
    %cst_30 = arith.constant dense<0.000000e+00> : vector<8x8xf32>
    %64 = tpu.matmul %63, %50, %cst_30 {dimension_numbers = #tpu.dot_dimension_numbers<[1], [0], [0], [1], [0, 0, 1, 1], [], []>} : vector<8x8xbf16>, vector<8x8xbf16>, vector<8x8xf32> -> vector<8x8xf32>
    %65 = vector.extract_strided_slice %47 {offsets = [0, 8], sizes = [8, 8], strides = [1, 1]} : vector<8x32xbf16> to vector<8x8xbf16>
    %66 = vector.extract_strided_slice %44 {offsets = [0, 8], sizes = [8, 8], strides = [1, 1]} : vector<8x64xbf16> to vector<8x8xbf16>
    %67 = vector.extract_strided_slice %44 {offsets = [0, 40], sizes = [8, 8], strides = [1, 1]} : vector<8x64xbf16> to vector<8x8xbf16>
    %cst_31 = arith.constant dense<0.000000e+00> : vector<8x8xf32>
    %68 = tpu.matmul %65, %66, %cst_31 {dimension_numbers = #tpu.dot_dimension_numbers<[1], [1], [0], [0], [0, 0, 1, 0], [], []>} : vector<8x8xbf16>, vector<8x8xbf16>, vector<8x8xf32> -> vector<8x8xf32>
    %69 = arith.addf %68, %12 : vector<8x8xf32>
    %cst_32 = arith.constant dense<0xFF800000> : vector<8xf32>
    %70 = vector.multi_reduction <maximumf>, %69, %cst_32 [1] : vector<8x8xf32> to vector<8xf32>
    %71 = vector.shape_cast %70 : vector<8xf32> to vector<8x1xf32>
    %72 = vector.broadcast %71 : vector<8x1xf32> to vector<8x8xf32>
    %73 = arith.subf %69, %72 : vector<8x8xf32>
    %74 = math.exp %73 : vector<8x8xf32>
    %cst_33 = arith.constant dense<0.000000e+00> : vector<8xf32>
    %75 = vector.multi_reduction <add>, %74, %cst_33 [1] : vector<8x8xf32> to vector<8xf32>
    %76 = vector.shape_cast %75 : vector<8xf32> to vector<8x1xf32>
    %77 = tpu.reciprocal %76 {approx = true} : vector<8x1xf32> -> vector<8x1xf32>
    %78 = vector.broadcast %77 : vector<8x1xf32> to vector<8x8xf32>
    %79 = arith.mulf %74, %78 : vector<8x8xf32>
    %80 = arith.truncf %79 : vector<8x8xf32> to vector<8x8xbf16>
    %cst_34 = arith.constant dense<0.000000e+00> : vector<8x8xf32>
    %81 = tpu.matmul %80, %67, %cst_34 {dimension_numbers = #tpu.dot_dimension_numbers<[1], [0], [0], [1], [0, 0, 1, 1], [], []>} : vector<8x8xbf16>, vector<8x8xbf16>, vector<8x8xf32> -> vector<8x8xf32>
    %82 = vector.extract_strided_slice %47 {offsets = [0, 16], sizes = [8, 8], strides = [1, 1]} : vector<8x32xbf16> to vector<8x8xbf16>
    %83 = vector.extract_strided_slice %44 {offsets = [0, 16], sizes = [8, 8], strides = [1, 1]} : vector<8x64xbf16> to vector<8x8xbf16>
    %84 = vector.extract_strided_slice %44 {offsets = [0, 48], sizes = [8, 8], strides = [1, 1]} : vector<8x64xbf16> to vector<8x8xbf16>
    %cst_35 = arith.constant dense<0.000000e+00> : vector<8x8xf32>
    %85 = tpu.matmul %82, %83, %cst_35 {dimension_numbers = #tpu.dot_dimension_numbers<[1], [1], [0], [0], [0, 0, 1, 0], [], []>} : vector<8x8xbf16>, vector<8x8xbf16>, vector<8x8xf32> -> vector<8x8xf32>
    %86 = arith.addf %85, %12 : vector<8x8xf32>
    %cst_36 = arith.constant dense<0xFF800000> : vector<8xf32>
    %87 = vector.multi_reduction <maximumf>, %86, %cst_36 [1] : vector<8x8xf32> to vector<8xf32>
    %88 = vector.shape_cast %87 : vector<8xf32> to vector<8x1xf32>
    %89 = vector.broadcast %88 : vector<8x1xf32> to vector<8x8xf32>
    %90 = arith.subf %86, %89 : vector<8x8xf32>
    %91 = math.exp %90 : vector<8x8xf32>
    %cst_37 = arith.constant dense<0.000000e+00> : vector<8xf32>
    %92 = vector.multi_reduction <add>, %91, %cst_37 [1] : vector<8x8xf32> to vector<8xf32>
    %93 = vector.shape_cast %92 : vector<8xf32> to vector<8x1xf32>
    %94 = tpu.reciprocal %93 {approx = true} : vector<8x1xf32> -> vector<8x1xf32>
    %95 = vector.broadcast %94 : vector<8x1xf32> to vector<8x8xf32>
    %96 = arith.mulf %91, %95 : vector<8x8xf32>
    %97 = arith.truncf %96 : vector<8x8xf32> to vector<8x8xbf16>
    %cst_38 = arith.constant dense<0.000000e+00> : vector<8x8xf32>
    %98 = tpu.matmul %97, %84, %cst_38 {dimension_numbers = #tpu.dot_dimension_numbers<[1], [0], [0], [1], [0, 0, 1, 1], [], []>} : vector<8x8xbf16>, vector<8x8xbf16>, vector<8x8xf32> -> vector<8x8xf32>
    %99 = vector.extract_strided_slice %47 {offsets = [0, 24], sizes = [8, 8], strides = [1, 1]} : vector<8x32xbf16> to vector<8x8xbf16>
    %100 = vector.extract_strided_slice %44 {offsets = [0, 24], sizes = [8, 8], strides = [1, 1]} : vector<8x64xbf16> to vector<8x8xbf16>
    %101 = vector.extract_strided_slice %44 {offsets = [0, 56], sizes = [8, 8], strides = [1, 1]} : vector<8x64xbf16> to vector<8x8xbf16>
    %cst_39 = arith.constant dense<0.000000e+00> : vector<8x8xf32>
    %102 = tpu.matmul %99, %100, %cst_39 {dimension_numbers = #tpu.dot_dimension_numbers<[1], [1], [0], [0], [0, 0, 1, 0], [], []>} : vector<8x8xbf16>, vector<8x8xbf16>, vector<8x8xf32> -> vector<8x8xf32>
    %103 = arith.addf %102, %12 : vector<8x8xf32>
    %cst_40 = arith.constant dense<0xFF800000> : vector<8xf32>
    %104 = vector.multi_reduction <maximumf>, %103, %cst_40 [1] : vector<8x8xf32> to vector<8xf32>
    %105 = vector.shape_cast %104 : vector<8xf32> to vector<8x1xf32>
    %106 = vector.broadcast %105 : vector<8x1xf32> to vector<8x8xf32>
    %107 = arith.subf %103, %106 : vector<8x8xf32>
    %108 = math.exp %107 : vector<8x8xf32>
    %cst_41 = arith.constant dense<0.000000e+00> : vector<8xf32>
    %109 = vector.multi_reduction <add>, %108, %cst_41 [1] : vector<8x8xf32> to vector<8xf32>
    %110 = vector.shape_cast %109 : vector<8xf32> to vector<8x1xf32>
    %111 = tpu.reciprocal %110 {approx = true} : vector<8x1xf32> -> vector<8x1xf32>
    %112 = vector.broadcast %111 : vector<8x1xf32> to vector<8x8xf32>
    %113 = arith.mulf %108, %112 : vector<8x8xf32>
    %114 = arith.truncf %113 : vector<8x8xf32> to vector<8x8xbf16>
    %cst_42 = arith.constant dense<0.000000e+00> : vector<8x8xf32>
    %115 = tpu.matmul %114, %101, %cst_42 {dimension_numbers = #tpu.dot_dimension_numbers<[1], [0], [0], [1], [0, 0, 1, 1], [], []>} : vector<8x8xbf16>, vector<8x8xbf16>, vector<8x8xf32> -> vector<8x8xf32>
    %116 = tpu.concatenate %64, %81, %98, %115 in 1 : vector<8x8xf32>, vector<8x8xf32>, vector<8x8xf32>, vector<8x8xf32> -> vector<8x32xf32>
    %117 = arith.truncf %116 : vector<8x32xf32> to vector<8x32xbf16>
    %cst_43 = arith.constant dense<0.000000e+00> : vector<8x32xf32>
    %118 = tpu.matmul %117, %45, %cst_43 {dimension_numbers = #tpu.dot_dimension_numbers<[1], [0], [0], [1], [0, 0, 1, 1], [], []>} : vector<8x32xbf16>, vector<32x32xbf16>, vector<8x32xf32> -> vector<8x32xf32>
    %119 = vector.broadcast %46 : vector<1x32xf32> to vector<8x32xf32>
    %120 = arith.addf %118, %119 : vector<8x32xf32>
    %121 = arith.addf %9, %120 : vector<8x32xf32>
    %c0_44 = arith.constant 0 : index
    %c0_45 = arith.constant 0 : index
    %122 = vector.load %arg14[%c0_44, %c0_45] : memref<1x32xf32, #tpu.memory_space<vmem>>, vector<1x32xf32>
    %c0_46 = arith.constant 0 : index
    %c0_47 = arith.constant 0 : index
    %123 = vector.load %arg15[%c0_46, %c0_47] : memref<1x32xf32, #tpu.memory_space<vmem>>, vector<1x32xf32>
    %cst_48 = arith.constant dense<0.000000e+00> : vector<8xf32>
    %124 = vector.multi_reduction <add>, %121, %cst_48 [1] : vector<8x32xf32> to vector<8xf32>
    %125 = vector.shape_cast %124 : vector<8xf32> to vector<8x1xf32>
    %cst_49 = arith.constant 3.200000e+01 : f32
    %126 = vector.broadcast %cst_49 : f32 to vector<8x1xf32>
    %127 = arith.divf %125, %126 : vector<8x1xf32>
    %128 = vector.broadcast %127 : vector<8x1xf32> to vector<8x32xf32>
    %129 = arith.subf %121, %128 : vector<8x32xf32>
    %130 = arith.mulf %129, %129 : vector<8x32xf32>
    %cst_50 = arith.constant dense<0.000000e+00> : vector<8xf32>
    %131 = vector.multi_reduction <add>, %130, %cst_50 [1] : vector<8x32xf32> to vector<8xf32>
    %132 = vector.shape_cast %131 : vector<8xf32> to vector<8x1xf32>
    %cst_51 = arith.constant 3.200000e+01 : f32
    %133 = vector.broadcast %cst_51 : f32 to vector<8x1xf32>
    %134 = arith.divf %132, %133 : vector<8x1xf32>
    %135 = vector.broadcast %127 : vector<8x1xf32> to vector<8x32xf32>
    %136 = arith.subf %121, %135 : vector<8x32xf32>
    %cst_52 = arith.constant 9.99999974E-6 : f32
    %137 = vector.broadcast %cst_52 : f32 to vector<8x1xf32>
    %138 = arith.addf %134, %137 : vector<8x1xf32>
    %139 = math.rsqrt %138 : vector<8x1xf32>
    %140 = vector.broadcast %139 : vector<8x1xf32> to vector<8x32xf32>
    %141 = arith.mulf %136, %140 : vector<8x32xf32>
    %142 = vector.broadcast %122 : vector<1x32xf32> to vector<8x32xf32>
    %143 = arith.mulf %141, %142 : vector<8x32xf32>
    %144 = vector.broadcast %123 : vector<1x32xf32> to vector<8x32xf32>
    %145 = arith.addf %143, %144 : vector<8x32xf32>
    %146 = arith.truncf %145 : vector<8x32xf32> to vector<8x32xbf16>
    %c0_53 = arith.constant 0 : index
    %c0_54 = arith.constant 0 : index
    %147 = vector.load %arg16[%c0_53, %c0_54] : memref<32x32xbf16, #tpu.memory_space<vmem>>, vector<32x32xbf16>
    %cst_55 = arith.constant dense<0.000000e+00> : vector<8x32xf32>
    %148 = tpu.matmul %146, %147, %cst_55 {dimension_numbers = #tpu.dot_dimension_numbers<[1], [0], [0], [1], [0, 0, 1, 1], [], []>} : vector<8x32xbf16>, vector<32x32xbf16>, vector<8x32xf32> -> vector<8x32xf32>
    %c0_56 = arith.constant 0 : index
    %c0_57 = arith.constant 0 : index
    %149 = vector.load %arg17[%c0_56, %c0_57] : memref<1x32xf32, #tpu.memory_space<vmem>>, vector<1x32xf32>
    %150 = vector.broadcast %149 : vector<1x32xf32> to vector<8x32xf32>
    %151 = arith.addf %148, %150 : vector<8x32xf32>
    %c0_58 = arith.constant 0 : index
    %c0_59 = arith.constant 0 : index
    %152 = vector.load %arg30[%c0_58, %c0_59] : memref<8x64xbf16, #tpu.memory_space<vmem>>, vector<8x64xbf16>
    %c0_60 = arith.constant 0 : index
    %c0_61 = arith.constant 0 : index
    %153 = vector.load %arg20[%c0_60, %c0_61] : memref<32x32xbf16, #tpu.memory_space<vmem>>, vector<32x32xbf16>
    %c0_62 = arith.constant 0 : index
    %c0_63 = arith.constant 0 : index
    %154 = vector.load %arg21[%c0_62, %c0_63] : memref<1x32xf32, #tpu.memory_space<vmem>>, vector<1x32xf32>
    %155 = arith.truncf %151 : vector<8x32xf32> to vector<8x32xbf16>
    %156 = vector.extract_strided_slice %155 {offsets = [0, 0], sizes = [8, 8], strides = [1, 1]} : vector<8x32xbf16> to vector<8x8xbf16>
    %157 = vector.extract_strided_slice %152 {offsets = [0, 0], sizes = [8, 8], strides = [1, 1]} : vector<8x64xbf16> to vector<8x8xbf16>
    %158 = vector.extract_strided_slice %152 {offsets = [0, 32], sizes = [8, 8], strides = [1, 1]} : vector<8x64xbf16> to vector<8x8xbf16>
    %cst_64 = arith.constant dense<0.000000e+00> : vector<8x8xf32>
    %159 = tpu.matmul %156, %157, %cst_64 {dimension_numbers = #tpu.dot_dimension_numbers<[1], [1], [0], [0], [0, 0, 1, 0], [], []>} : vector<8x8xbf16>, vector<8x8xbf16>, vector<8x8xf32> -> vector<8x8xf32>
    %160 = arith.addf %159, %15 : vector<8x8xf32>
    %cst_65 = arith.constant dense<0xFF800000> : vector<8xf32>
    %161 = vector.multi_reduction <maximumf>, %160, %cst_65 [1] : vector<8x8xf32> to vector<8xf32>
    %162 = vector.shape_cast %161 : vector<8xf32> to vector<8x1xf32>
    %163 = vector.broadcast %162 : vector<8x1xf32> to vector<8x8xf32>
    %164 = arith.subf %160, %163 : vector<8x8xf32>
    %165 = math.exp %164 : vector<8x8xf32>
    %cst_66 = arith.constant dense<0.000000e+00> : vector<8xf32>
    %166 = vector.multi_reduction <add>, %165, %cst_66 [1] : vector<8x8xf32> to vector<8xf32>
    %167 = vector.shape_cast %166 : vector<8xf32> to vector<8x1xf32>
    %168 = tpu.reciprocal %167 {approx = true} : vector<8x1xf32> -> vector<8x1xf32>
    %169 = vector.broadcast %168 : vector<8x1xf32> to vector<8x8xf32>
    %170 = arith.mulf %165, %169 : vector<8x8xf32>
    %171 = arith.truncf %170 : vector<8x8xf32> to vector<8x8xbf16>
    %cst_67 = arith.constant dense<0.000000e+00> : vector<8x8xf32>
    %172 = tpu.matmul %171, %158, %cst_67 {dimension_numbers = #tpu.dot_dimension_numbers<[1], [0], [0], [1], [0, 0, 1, 1], [], []>} : vector<8x8xbf16>, vector<8x8xbf16>, vector<8x8xf32> -> vector<8x8xf32>
    %173 = vector.extract_strided_slice %155 {offsets = [0, 8], sizes = [8, 8], strides = [1, 1]} : vector<8x32xbf16> to vector<8x8xbf16>
    %174 = vector.extract_strided_slice %152 {offsets = [0, 8], sizes = [8, 8], strides = [1, 1]} : vector<8x64xbf16> to vector<8x8xbf16>
    %175 = vector.extract_strided_slice %152 {offsets = [0, 40], sizes = [8, 8], strides = [1, 1]} : vector<8x64xbf16> to vector<8x8xbf16>
    %cst_68 = arith.constant dense<0.000000e+00> : vector<8x8xf32>
    %176 = tpu.matmul %173, %174, %cst_68 {dimension_numbers = #tpu.dot_dimension_numbers<[1], [1], [0], [0], [0, 0, 1, 0], [], []>} : vector<8x8xbf16>, vector<8x8xbf16>, vector<8x8xf32> -> vector<8x8xf32>
    %177 = arith.addf %176, %15 : vector<8x8xf32>
    %cst_69 = arith.constant dense<0xFF800000> : vector<8xf32>
    %178 = vector.multi_reduction <maximumf>, %177, %cst_69 [1] : vector<8x8xf32> to vector<8xf32>
    %179 = vector.shape_cast %178 : vector<8xf32> to vector<8x1xf32>
    %180 = vector.broadcast %179 : vector<8x1xf32> to vector<8x8xf32>
    %181 = arith.subf %177, %180 : vector<8x8xf32>
    %182 = math.exp %181 : vector<8x8xf32>
    %cst_70 = arith.constant dense<0.000000e+00> : vector<8xf32>
    %183 = vector.multi_reduction <add>, %182, %cst_70 [1] : vector<8x8xf32> to vector<8xf32>
    %184 = vector.shape_cast %183 : vector<8xf32> to vector<8x1xf32>
    %185 = tpu.reciprocal %184 {approx = true} : vector<8x1xf32> -> vector<8x1xf32>
    %186 = vector.broadcast %185 : vector<8x1xf32> to vector<8x8xf32>
    %187 = arith.mulf %182, %186 : vector<8x8xf32>
    %188 = arith.truncf %187 : vector<8x8xf32> to vector<8x8xbf16>
    %cst_71 = arith.constant dense<0.000000e+00> : vector<8x8xf32>
    %189 = tpu.matmul %188, %175, %cst_71 {dimension_numbers = #tpu.dot_dimension_numbers<[1], [0], [0], [1], [0, 0, 1, 1], [], []>} : vector<8x8xbf16>, vector<8x8xbf16>, vector<8x8xf32> -> vector<8x8xf32>
    %190 = vector.extract_strided_slice %155 {offsets = [0, 16], sizes = [8, 8], strides = [1, 1]} : vector<8x32xbf16> to vector<8x8xbf16>
    %191 = vector.extract_strided_slice %152 {offsets = [0, 16], sizes = [8, 8], strides = [1, 1]} : vector<8x64xbf16> to vector<8x8xbf16>
    %192 = vector.extract_strided_slice %152 {offsets = [0, 48], sizes = [8, 8], strides = [1, 1]} : vector<8x64xbf16> to vector<8x8xbf16>
    %cst_72 = arith.constant dense<0.000000e+00> : vector<8x8xf32>
    %193 = tpu.matmul %190, %191, %cst_72 {dimension_numbers = #tpu.dot_dimension_numbers<[1], [1], [0], [0], [0, 0, 1, 0], [], []>} : vector<8x8xbf16>, vector<8x8xbf16>, vector<8x8xf32> -> vector<8x8xf32>
    %194 = arith.addf %193, %15 : vector<8x8xf32>
    %cst_73 = arith.constant dense<0xFF800000> : vector<8xf32>
    %195 = vector.multi_reduction <maximumf>, %194, %cst_73 [1] : vector<8x8xf32> to vector<8xf32>
    %196 = vector.shape_cast %195 : vector<8xf32> to vector<8x1xf32>
    %197 = vector.broadcast %196 : vector<8x1xf32> to vector<8x8xf32>
    %198 = arith.subf %194, %197 : vector<8x8xf32>
    %199 = math.exp %198 : vector<8x8xf32>
    %cst_74 = arith.constant dense<0.000000e+00> : vector<8xf32>
    %200 = vector.multi_reduction <add>, %199, %cst_74 [1] : vector<8x8xf32> to vector<8xf32>
    %201 = vector.shape_cast %200 : vector<8xf32> to vector<8x1xf32>
    %202 = tpu.reciprocal %201 {approx = true} : vector<8x1xf32> -> vector<8x1xf32>
    %203 = vector.broadcast %202 : vector<8x1xf32> to vector<8x8xf32>
    %204 = arith.mulf %199, %203 : vector<8x8xf32>
    %205 = arith.truncf %204 : vector<8x8xf32> to vector<8x8xbf16>
    %cst_75 = arith.constant dense<0.000000e+00> : vector<8x8xf32>
    %206 = tpu.matmul %205, %192, %cst_75 {dimension_numbers = #tpu.dot_dimension_numbers<[1], [0], [0], [1], [0, 0, 1, 1], [], []>} : vector<8x8xbf16>, vector<8x8xbf16>, vector<8x8xf32> -> vector<8x8xf32>
    %207 = vector.extract_strided_slice %155 {offsets = [0, 24], sizes = [8, 8], strides = [1, 1]} : vector<8x32xbf16> to vector<8x8xbf16>
    %208 = vector.extract_strided_slice %152 {offsets = [0, 24], sizes = [8, 8], strides = [1, 1]} : vector<8x64xbf16> to vector<8x8xbf16>
    %209 = vector.extract_strided_slice %152 {offsets = [0, 56], sizes = [8, 8], strides = [1, 1]} : vector<8x64xbf16> to vector<8x8xbf16>
    %cst_76 = arith.constant dense<0.000000e+00> : vector<8x8xf32>
    %210 = tpu.matmul %207, %208, %cst_76 {dimension_numbers = #tpu.dot_dimension_numbers<[1], [1], [0], [0], [0, 0, 1, 0], [], []>} : vector<8x8xbf16>, vector<8x8xbf16>, vector<8x8xf32> -> vector<8x8xf32>
    %211 = arith.addf %210, %15 : vector<8x8xf32>
    %cst_77 = arith.constant dense<0xFF800000> : vector<8xf32>
    %212 = vector.multi_reduction <maximumf>, %211, %cst_77 [1] : vector<8x8xf32> to vector<8xf32>
    %213 = vector.shape_cast %212 : vector<8xf32> to vector<8x1xf32>
    %214 = vector.broadcast %213 : vector<8x1xf32> to vector<8x8xf32>
    %215 = arith.subf %211, %214 : vector<8x8xf32>
    %216 = math.exp %215 : vector<8x8xf32>
    %cst_78 = arith.constant dense<0.000000e+00> : vector<8xf32>
    %217 = vector.multi_reduction <add>, %216, %cst_78 [1] : vector<8x8xf32> to vector<8xf32>
    %218 = vector.shape_cast %217 : vector<8xf32> to vector<8x1xf32>
    %219 = tpu.reciprocal %218 {approx = true} : vector<8x1xf32> -> vector<8x1xf32>
    %220 = vector.broadcast %219 : vector<8x1xf32> to vector<8x8xf32>
    %221 = arith.mulf %216, %220 : vector<8x8xf32>
    %222 = arith.truncf %221 : vector<8x8xf32> to vector<8x8xbf16>
    %cst_79 = arith.constant dense<0.000000e+00> : vector<8x8xf32>
    %223 = tpu.matmul %222, %209, %cst_79 {dimension_numbers = #tpu.dot_dimension_numbers<[1], [0], [0], [1], [0, 0, 1, 1], [], []>} : vector<8x8xbf16>, vector<8x8xbf16>, vector<8x8xf32> -> vector<8x8xf32>
    %224 = tpu.concatenate %172, %189, %206, %223 in 1 : vector<8x8xf32>, vector<8x8xf32>, vector<8x8xf32>, vector<8x8xf32> -> vector<8x32xf32>
    %225 = arith.truncf %224 : vector<8x32xf32> to vector<8x32xbf16>
    %cst_80 = arith.constant dense<0.000000e+00> : vector<8x32xf32>
    %226 = tpu.matmul %225, %153, %cst_80 {dimension_numbers = #tpu.dot_dimension_numbers<[1], [0], [0], [1], [0, 0, 1, 1], [], []>} : vector<8x32xbf16>, vector<32x32xbf16>, vector<8x32xf32> -> vector<8x32xf32>
    %227 = vector.broadcast %154 : vector<1x32xf32> to vector<8x32xf32>
    %228 = arith.addf %226, %227 : vector<8x32xf32>
    %229 = arith.addf %121, %228 : vector<8x32xf32>
    %c0_81 = arith.constant 0 : index
    %c0_82 = arith.constant 0 : index
    %230 = vector.load %arg22[%c0_81, %c0_82] : memref<1x32xf32, #tpu.memory_space<vmem>>, vector<1x32xf32>
    %c0_83 = arith.constant 0 : index
    %c0_84 = arith.constant 0 : index
    %231 = vector.load %arg23[%c0_83, %c0_84] : memref<1x32xf32, #tpu.memory_space<vmem>>, vector<1x32xf32>
    %cst_85 = arith.constant dense<0.000000e+00> : vector<8xf32>
    %232 = vector.multi_reduction <add>, %229, %cst_85 [1] : vector<8x32xf32> to vector<8xf32>
    %233 = vector.shape_cast %232 : vector<8xf32> to vector<8x1xf32>
    %cst_86 = arith.constant 3.200000e+01 : f32
    %234 = vector.broadcast %cst_86 : f32 to vector<8x1xf32>
    %235 = arith.divf %233, %234 : vector<8x1xf32>
    %236 = vector.broadcast %235 : vector<8x1xf32> to vector<8x32xf32>
    %237 = arith.subf %229, %236 : vector<8x32xf32>
    %238 = arith.mulf %237, %237 : vector<8x32xf32>
    %cst_87 = arith.constant dense<0.000000e+00> : vector<8xf32>
    %239 = vector.multi_reduction <add>, %238, %cst_87 [1] : vector<8x32xf32> to vector<8xf32>
    %240 = vector.shape_cast %239 : vector<8xf32> to vector<8x1xf32>
    %cst_88 = arith.constant 3.200000e+01 : f32
    %241 = vector.broadcast %cst_88 : f32 to vector<8x1xf32>
    %242 = arith.divf %240, %241 : vector<8x1xf32>
    %243 = vector.broadcast %235 : vector<8x1xf32> to vector<8x32xf32>
    %244 = arith.subf %229, %243 : vector<8x32xf32>
    %cst_89 = arith.constant 9.99999974E-6 : f32
    %245 = vector.broadcast %cst_89 : f32 to vector<8x1xf32>
    %246 = arith.addf %242, %245 : vector<8x1xf32>
    %247 = math.rsqrt %246 : vector<8x1xf32>
    %248 = vector.broadcast %247 : vector<8x1xf32> to vector<8x32xf32>
    %249 = arith.mulf %244, %248 : vector<8x32xf32>
    %250 = vector.broadcast %230 : vector<1x32xf32> to vector<8x32xf32>
    %251 = arith.mulf %249, %250 : vector<8x32xf32>
    %252 = vector.broadcast %231 : vector<1x32xf32> to vector<8x32xf32>
    %253 = arith.addf %251, %252 : vector<8x32xf32>
    %254 = arith.truncf %253 : vector<8x32xf32> to vector<8x32xbf16>
    %c0_90 = arith.constant 0 : index
    %c0_91 = arith.constant 0 : index
    %255 = vector.load %arg24[%c0_90, %c0_91] : memref<32x64xbf16, #tpu.memory_space<vmem>>, vector<32x64xbf16>
    %cst_92 = arith.constant dense<0.000000e+00> : vector<8x64xf32>
    %256 = tpu.matmul %254, %255, %cst_92 {dimension_numbers = #tpu.dot_dimension_numbers<[1], [0], [0], [1], [0, 0, 1, 1], [], []>} : vector<8x32xbf16>, vector<32x64xbf16>, vector<8x64xf32> -> vector<8x64xf32>
    %c0_93 = arith.constant 0 : index
    %c0_94 = arith.constant 0 : index
    %257 = vector.load %arg25[%c0_93, %c0_94] : memref<1x64xf32, #tpu.memory_space<vmem>>, vector<1x64xf32>
    %258 = vector.broadcast %257 : vector<1x64xf32> to vector<8x64xf32>
    %259 = arith.addf %256, %258 : vector<8x64xf32>
    %cst_95 = arith.constant 0.000000e+00 : f32
    %260 = vector.broadcast %cst_95 : f32 to vector<8x64xf32>
    %261 = arith.maximumf %259, %260 : vector<8x64xf32>
    %262 = arith.truncf %261 : vector<8x64xf32> to vector<8x64xbf16>
    %c0_96 = arith.constant 0 : index
    %c0_97 = arith.constant 0 : index
    %263 = vector.load %arg26[%c0_96, %c0_97] : memref<64x32xbf16, #tpu.memory_space<vmem>>, vector<64x32xbf16>
    %cst_98 = arith.constant dense<0.000000e+00> : vector<8x32xf32>
    %264 = tpu.matmul %262, %263, %cst_98 {dimension_numbers = #tpu.dot_dimension_numbers<[1], [0], [0], [1], [0, 0, 1, 1], [], []>} : vector<8x64xbf16>, vector<64x32xbf16>, vector<8x32xf32> -> vector<8x32xf32>
    %c0_99 = arith.constant 0 : index
    %c0_100 = arith.constant 0 : index
    %265 = vector.load %arg27[%c0_99, %c0_100] : memref<1x32xf32, #tpu.memory_space<vmem>>, vector<1x32xf32>
    %266 = vector.broadcast %265 : vector<1x32xf32> to vector<8x32xf32>
    %267 = arith.addf %264, %266 : vector<8x32xf32>
    %268 = arith.addf %229, %267 : vector<8x32xf32>
    %c0_101 = arith.constant 0 : index
    %c0_102 = arith.constant 0 : index
    %c0_103 = arith.constant 0 : index
    %269 = vector.load %arg28[%c0_101, %c0_102, %c0_103] : memref<1x8x32xf32, #tpu.memory_space<vmem>>, vector<1x8x32xf32>
    %270 = vector.shape_cast %269 : vector<1x8x32xf32> to vector<8x32xf32>
    %271 = vector.shape_cast %268 : vector<8x32xf32> to vector<1x8x32xf32>
    tpu.vector_store %arg28[%c0_101, %c0_102, %c0_103], %271 {strides = array<i32>} : memref<1x8x32xf32, #tpu.memory_space<vmem>>, vector<1x8x32xf32>,
    return
  }
  func.func @transform_0(%arg0: i32, %arg1: i32) -> (i32, i32, i32) {
    %c0_i32 = arith.constant 0 : i32
    %c0_i32_0 = arith.constant 0 : i32
    %c0_i32_1 = arith.constant 0 : i32
    return %arg0, %c0_i32, %c0_i32_0 : i32, i32, i32
  }
  func.func @transform_1(%arg0: i32, %arg1: i32) -> (i32, i32, i32) {
    %c0_i32 = arith.constant 0 : i32
    %c0_i32_0 = arith.constant 0 : i32
    %c0_i32_1 = arith.constant 0 : i32
    return %arg0, %c0_i32, %c0_i32_0 : i32, i32, i32
  }
  func.func @transform_2(%arg0: i32, %arg1: i32) -> (i32, i32, i32) {
    %c0_i32 = arith.constant 0 : i32
    %c0_i32_0 = arith.constant 0 : i32
    return %arg0, %arg1, %c0_i32 : i32, i32, i32
  }
  func.func @transform_3(%arg0: i32, %arg1: i32) -> (i32, i32, i32) {
    %c0_i32 = arith.constant 0 : i32
    %c0_i32_0 = arith.constant 0 : i32
    return %arg0, %arg1, %c0_i32 : i32, i32, i32
  }
  func.func @transform_4(%arg0: i32, %arg1: i32) -> (i32, i32) {
    %c0_i32 = arith.constant 0 : i32
    %c0_i32_0 = arith.constant 0 : i32
    %c0_i32_1 = arith.constant 0 : i32
    return %c0_i32, %c0_i32_0 : i32, i32
  }
  func.func @transform_5(%arg0: i32, %arg1: i32) -> (i32, i32) {
    %c0_i32 = arith.constant 0 : i32
    %c0_i32_0 = arith.constant 0 : i32
    %c0_i32_1 = arith.constant 0 : i32
    return %c0_i32, %c0_i32_0 : i32, i32
  }
  func.func @transform_6(%arg0: i32, %arg1: i32) -> (i32, i32) {
    %c0_i32 = arith.constant 0 : i32
    %c0_i32_0 = arith.constant 0 : i32
    %c0_i32_1 = arith.constant 0 : i32
    return %c0_i32, %c0_i32_0 : i32, i32
  }
  func.func @transform_7(%arg0: i32, %arg1: i32) -> (i32, i32) {
    %c0_i32 = arith.constant 0 : i32
    %c0_i32_0 = arith.constant 0 : i32
    %c0_i32_1 = arith.constant 0 : i32
    return %c0_i32, %c0_i32_0 : i32, i32
  }
  func.func @transform_8(%arg0: i32, %arg1: i32) -> (i32, i32) {
    %c0_i32 = arith.constant 0 : i32
    %c0_i32_0 = arith.constant 0 : i32
    %c0_i32_1 = arith.constant 0 : i32
    return %c0_i32, %c0_i32_0 : i32, i32
  }
  func.func @transform_9(%arg0: i32, %arg1: i32) -> (i32, i32) {
    %c0_i32 = arith.constant 0 : i32
    %c0_i32_0 = arith.constant 0 : i32
    %c0_i32_1 = arith.constant 0 : i32
    return %c0_i32, %c0_i32_0 : i32, i32
  }
  func.func @transform_10(%arg0: i32, %arg1: i32) -> (i32, i32) {
    %c0_i32 = arith.constant 0 : i32
    %c0_i32_0 = arith.constant 0 : i32
    %c0_i32_1 = arith.constant 0 : i32
    return %c0_i32, %c0_i32_0 : i32, i32
  }
  func.func @transform_11(%arg0: i32, %arg1: i32) -> (i32, i32) {
    %c0_i32 = arith.constant 0 : i32
    %c0_i32_0 = arith.constant 0 : i32
    %c0_i32_1 = arith.constant 0 : i32
    return %c0_i32, %c0_i32_0 : i32, i32
  }
  func.func @transform_12(%arg0: i32, %arg1: i32) -> (i32, i32) {
    %c0_i32 = arith.constant 0 : i32
    %c0_i32_0 = arith.constant 0 : i32
    %c0_i32_1 = arith.constant 0 : i32
    return %c0_i32, %c0_i32_0 : i32, i32
  }
  func.func @transform_13(%arg0: i32, %arg1: i32) -> (i32, i32) {
    %c0_i32 = arith.constant 0 : i32
    %c0_i32_0 = arith.constant 0 : i32
    %c0_i32_1 = arith.constant 0 : i32
    return %c0_i32, %c0_i32_0 : i32, i32
  }
  func.func @transform_14(%arg0: i32, %arg1: i32) -> (i32, i32) {
    %c0_i32 = arith.constant 0 : i32
    %c0_i32_0 = arith.constant 0 : i32
    %c0_i32_1 = arith.constant 0 : i32
    return %c0_i32, %c0_i32_0 : i32, i32
  }
  func.func @transform_15(%arg0: i32, %arg1: i32) -> (i32, i32) {
    %c0_i32 = arith.constant 0 : i32
    %c0_i32_0 = arith.constant 0 : i32
    %c0_i32_1 = arith.constant 0 : i32
    return %c0_i32, %c0_i32_0 : i32, i32
  }
  func.func @transform_16(%arg0: i32, %arg1: i32) -> (i32, i32) {
    %c0_i32 = arith.constant 0 : i32
    %c0_i32_0 = arith.constant 0 : i32
    %c0_i32_1 = arith.constant 0 : i32
    return %c0_i32, %c0_i32_0 : i32, i32
  }
  func.func @transform_17(%arg0: i32, %arg1: i32) -> (i32, i32) {
    %c0_i32 = arith.constant 0 : i32
    %c0_i32_0 = arith.constant 0 : i32
    %c0_i32_1 = arith.constant 0 : i32
    return %c0_i32, %c0_i32_0 : i32, i32
  }
  func.func @transform_18(%arg0: i32, %arg1: i32) -> (i32, i32) {
    %c0_i32 = arith.constant 0 : i32
    %c0_i32_0 = arith.constant 0 : i32
    %c0_i32_1 = arith.constant 0 : i32
    return %c0_i32, %c0_i32_0 : i32, i32
  }
  func.func @transform_19(%arg0: i32, %arg1: i32) -> (i32, i32) {
    %c0_i32 = arith.constant 0 : i32
    %c0_i32_0 = arith.constant 0 : i32
    %c0_i32_1 = arith.constant 0 : i32
    return %c0_i32, %c0_i32_0 : i32, i32
  }
  func.func @transform_20(%arg0: i32, %arg1: i32) -> (i32, i32) {
    %c0_i32 = arith.constant 0 : i32
    %c0_i32_0 = arith.constant 0 : i32
    %c0_i32_1 = arith.constant 0 : i32
    return %c0_i32, %c0_i32_0 : i32, i32
  }
  func.func @transform_21(%arg0: i32, %arg1: i32) -> (i32, i32) {
    %c0_i32 = arith.constant 0 : i32
    %c0_i32_0 = arith.constant 0 : i32
    %c0_i32_1 = arith.constant 0 : i32
    return %c0_i32, %c0_i32_0 : i32, i32
  }
  func.func @transform_22(%arg0: i32, %arg1: i32) -> (i32, i32) {
    %c0_i32 = arith.constant 0 : i32
    %c0_i32_0 = arith.constant 0 : i32
    %c0_i32_1 = arith.constant 0 : i32
    return %c0_i32, %c0_i32_0 : i32, i32
  }
  func.func @transform_23(%arg0: i32, %arg1: i32) -> (i32, i32) {
    %c0_i32 = arith.constant 0 : i32
    %c0_i32_0 = arith.constant 0 : i32
    %c0_i32_1 = arith.constant 0 : i32
    return %c0_i32, %c0_i32_0 : i32, i32
  }
  func.func @transform_24(%arg0: i32, %arg1: i32) -> (i32, i32) {
    %c0_i32 = arith.constant 0 : i32
    %c0_i32_0 = arith.constant 0 : i32
    %c0_i32_1 = arith.constant 0 : i32
    return %c0_i32, %c0_i32_0 : i32, i32
  }
  func.func @transform_25(%arg0: i32, %arg1: i32) -> (i32, i32) {
    %c0_i32 = arith.constant 0 : i32
    %c0_i32_0 = arith.constant 0 : i32
    %c0_i32_1 = arith.constant 0 : i32
    return %c0_i32, %c0_i32_0 : i32, i32
  }
  func.func @transform_26(%arg0: i32, %arg1: i32) -> (i32, i32, i32) {
    %c0_i32 = arith.constant 0 : i32
    %c0_i32_0 = arith.constant 0 : i32
    return %arg0, %arg1, %c0_i32 : i32, i32, i32
  }
}

</mosaic_0001>

<bundles_post_ra>
// kernel: old_decoder_layer.1
= control target key start
LH: loop header
LB: loop body
LE: loop exit
PB: predicated region body
PF: predicated region fallthrough
CT: control target
= control target key end

     0   :  { %s3697_s0 = inlined_call_operand.vmem [shape: f32[2,8,32], index: 0, kind: input, shape index: {}]   ;;  %s3698_s1 = inlined_call_operand.vmem [shape: f32[2,8,32], index: 1, kind: input, shape index: {}]   ;;  %s3699_s2 = inlined_call_operand.vmem [shape: bf16[2,8,8], index: 2, kind: input, shape index: {}]   ;;  %s3700_s3 = inlined_call_operand.vmem [shape: bf16[2,8,8], index: 3, kind: input, shape index: {}]   ;;  %s3701_s4 = inlined_call_operand.vmem [shape: f32[1,32], index: 4, kind: input, shape index: {}]   ;;  %s3702_s5 = inlined_call_operand.vmem [shape: f32[1,32], index: 5, kind: input, shape index: {}]   ;;  %s3703_s6 = inlined_call_operand.vmem [shape: bf16[32,32], index: 6, kind: input, shape index: {}]   ;;  %s3704_s7 = inlined_call_operand.vmem [shape: f32[1,32], index: 7, kind: input, shape index: {}]   ;;  %s3705_s8 = inlined_call_operand.vmem [shape: bf16[32,64], index: 8, kind: input, shape index: {}]   ;;  %s3706_s9 = inlined_call_operand.vmem [shape: f32[1,64], index: 9, kind: input, shape index: {}]   ;;  %s3707_s10 = inlined_call_operand.vmem [shape: bf16[32,32], index: 10, kind: input, shape index: {}]   ;;  %s3708_s11 = inlined_call_operand.vmem [shape: f32[1,32], index: 11, kind: input, shape index: {}]   ;;  %s3709_s12 = inlined_call_operand.vmem [shape: f32[1,32], index: 12, kind: input, shape index: {}]   ;;  %s3710_s13 = inlined_call_operand.vmem [shape: f32[1,32], index: 13, kind: input, shape index: {}]   ;;  %s3711_s14 = inlined_call_operand.vmem [shape: bf16[32,32], index: 14, kind: input, shape index: {}]   ;;  %s3712_s15 = inlined_call_operand.vmem [shape: f32[1,32], index: 15, kind: input, shape index: {}]   ;;  %s3713_s16 = inlined_call_operand.vmem [shape: bf16[32,64], index: 16, kind: input, shape index: {}]   ;;  %s3714_s17 = inlined_call_operand.vmem [shape: f32[1,64], index: 17, kind: input, shape index: {}]   ;;  %s3715_s18 = inlined_call_operand.vmem [shape: bf16[32,32], index: 18, kind: input, shape index: {}]   ;;  %s3716_s19 = inlined_call_operand.vmem [shape: f32[1,32], index: 19, kind: input, shape index: {}]   ;;  %s3717_s20 = inlined_call_operand.vmem [shape: f32[1,32], index: 20, kind: input, shape index: {}]   ;;  %s3718_s21 = inlined_call_operand.vmem [shape: f32[1,32], index: 21, kind: input, shape index: {}]   ;;  %s3719_s22 = inlined_call_operand.vmem [shape: bf16[32,64], index: 22, kind: input, shape index: {}]   ;;  %s3720_s23 = inlined_call_operand.vmem [shape: f32[1,64], index: 23, kind: input, shape index: {}]   ;;  %s3721_s24 = inlined_call_operand.vmem [shape: bf16[64,32], index: 24, kind: input, shape index: {}]   ;;  %s3722_s25 = inlined_call_operand.vmem [shape: f32[1,32], index: 25, kind: input, shape index: {}]   ;;  %s3723_s26 = inlined_call_operand.hbm [shape: f32[2,8,32], index: 26, kind: output, shape index: {}]  }
   0x1   :  { %3745 = sst [smem:[#allocation12_spill]] %s3697_s0 }
   0x2   :  { %3746 = sst [smem:[#allocation13_spill]] %s3698_s1 }
   0x3   :  { %3747 = sst [smem:[#allocation14_spill]] %s3699_s2 }
   0x4   :  { %3748 = sst [smem:[#allocation15_spill]] %s3700_s3 }
   0x5   :  { %3749 = sst [smem:[#allocation16_spill]] %s3701_s4 }
   0x6   :  { %3750 = sst [smem:[#allocation17_spill]] %s3702_s5 }
   0x7   :  { %3751 = sst [smem:[#allocation18_spill]] %s3703_s6 }
   0x8   :  { %3752 = sst [smem:[#allocation19_spill]] %s3704_s7 }
   0x9   :  { %3753 = sst [smem:[#allocation20_spill]] %s3705_s8 }
   0xa   :  { %3754 = sst [smem:[#allocation21_spill]] %s3706_s9 }
   0xb   :  { %3755 = sst [smem:[#allocation22_spill]] %s3707_s10 }
   0xc   :  { %3756 = sst [smem:[#allocation23_spill]] %s3708_s11 }
   0xd   :  { %31 = vsyncpa [#allocation5], 0 }
   0xe   :  { %33 = vsyncpa [#allocation5 + $0x1], 0  ;;  %s3261_s27 = smov 0   ;;  %s3263_s3 = smov 0  }
   0xf   :  { %s3265_s7 = smov 0   ;;  %s3267_s28 = smov 0  }
  0x10   :  { %s3269_s8 = smov 0   ;;  %s3271_s4 = smov 0  }
  0x11 LB: > { %3757 = sst [smem:[#allocation7_spill]] %s3099_s7  ;;  %s2614_s29 = sadd.s32 4294967295, %s3111_s4   ;;  %s3111_s4 = sphi %s3271_s4, %s39_s4   ;;  %s3107_s8 = sphi %s3269_s8, %s3790_s8   ;;  %s3103_s28 = sphi %s3267_s28, %s3789_s28   ;;  %s3099_s7 = sphi %s3265_s7, %s3788_s7   ;;  %s3095_s3 = sphi %s3263_s3, %s3792_s3   ;;  %s3091_s27 = sphi %s3261_s27, %s3791_s27  }
  0x12   : > { %3758 = sst [smem:[#allocation8_spill]] %s3107_s8  ;;  %s2615_s0 = sadd.s32 4294967294, %s3111_s4  }
  0x13   : > { %s51_s9 = sadd.s32 1, %s3107_s8  ;;  %s630_s30 = sadd.s32 1, %s3099_s7 }
  0x14   : > { %p53_p0 = scmp.ge.s32.totalorder %s51_s9, 2  ;;  %p640_p1 = scmp.ne.s32.totalorder %s3099_s7, %s3095_s3 }
  0x15   : > { %p641_p2 = scmp.eq.s32.totalorder %s2614_s29, 1  ;;  %p646_p3 = scmp.ne.s32.totalorder %s3095_s3, %s3091_s27 }
  0x16   : > { %s3794_s9 = smov (%p53_p0, %s51_s9), 0  ;;  %p647_p5 = scmp.eq.s32.totalorder %s2615_s0, 1 }
  0x17   : > { %3759 = sst [smem:[#allocation9_spill]] %s3794_s9  ;;  %p3301_p4 = por %p641_p2, %p640_p1 }
  0x18   : > { %s625_s5 = ssub.s32 %s3107_s8, %s3794_s9  ;;  %p2618_p6 = scmp.ge.s32.totalorder %s3111_s4, 1 }
  0x19   : > { %p628_p7 = scmp.eq.s32.totalorder %s625_s5, 0  ;;  %p3308_p8 = por %p647_p5, %p646_p3 }
  0x1a   : > { %p765_p9 = scmp.lt.s32.totalorder %s3111_s4, 3 }
  0x1b   : > { %s3761_s10 = scalar_select %p3308_p8, 1, 0 }
  0x1c   : > { %s3314_s6 = scalar_select %p628_p7, %s3099_s7, %s630_s30  }
  0x1d   : > { %3762 = sst [smem:[#allocation10_spill]] %s3761_s10  ;;  %p766_p10 = pnand %p2618_p6, %p765_p9 }
  0x1e   : > { %3763 = sst [smem:[#allocation11_spill]] %s3314_s6  ;;  %p852_p11 = scmp.lt.s32.totalorder (!%p766_p10), %s3103_s28, 1 }
  0x1f   : > { %769 = sbr.rel (%p766_p10) target bundleno = 4140 (0x102c), region = 124  ;;  %s3764_s9 = sld [smem:[#allocation12_spill]] (!%p766_p10) }
  0x20   : > { %s3765_s30 = sld [smem:[#allocation20_spill]] (!%p766_p10)  ;;  %s3115_s5 = smov (!%p766_p10), 120  }
  0x21   : > { %s3766_s0 = sld [smem:[#allocation16_spill]] (!%p766_p10)  ;;  %s3734_s6 = smov (!%p766_p10), 88  }
  0x22   : > { %s3768_s10 = sld [smem:[#allocation18_spill]] (!%p766_p10) }
  0x23   : > { %s3775_s11 = sld [smem:[#allocation23_spill]] (!%p766_p10) }
  0x24   : > { %s3318_s1 = scalar_select %p852_p11, %s3103_s28, 1  ;;  %vm882_vm0 = vcmask 261120   ;;  %v3113_v13 = vmov 0.0   ;;  %vm3114_vm1 = vmmov 0   ;;  %v2979_v35 = vld [vmem:[%s3713_s16 + $0x8] sm:$0xff]   ;;  %v2980_v37 = vld [vmem:[%s3713_s16] sm:$0xff]  }
  0x25   : > { %2744 = vmatprep.subr.bf16.mxu0 %v3113_v13  ;;  %2748 = vmatprep.mubr.msk.bf16.mxu0 %vm3114_vm1, %v3113_v13  ;;  %vm979_vm2 = vcmask 519168   ;;  %vm1161_vm3 = vcmask 64512   ;;  %v2628_v56 = vld [vmem:[%s3714_s17] ss:$0 sm:$0xff]  ;;  %vm1228_vm4 = vcmask 1043456   ;;  %vm1616_vm5 = vcmask 130048  }
  0x26   : > { %s3729_s29 = sshll.u32 %s3318_s1, 3  ;;  %v2975_v12 = vld [vmem:[%s3765_s30 + $0x8] sm:$0xff]   ;;  %v2976_v14 = vld [vmem:[%s3765_s30] sm:$0xff]   ;;  %2752 = vmatprep.subr.bf16.mxu1 %v3113_v13  ;;  %2756 = vmatprep.mubr.msk.bf16.mxu1 %vm3114_vm1, %v3113_v13  ;;  %s3767_s30 = sld [smem:[#allocation17_spill]]  ;;  %vm1618_vm6 = vcmask 195584   ;;  %vm2441_vm7 = vcmask 523264  }
  0x27   : > { %s855_s8 = scalar_lea.vmem %s3764_s9, %s3729_s29  ;;  %2745 = vmatpush3.bf16.msra.mxu0 %v2975_v12  ;;  %v2684_v22 = vld [vmem:[%s3766_s0] ss:$0 sm:$0xff]  ;;  %s3769_s7 = sshll.u32 %s3318_s1, 3  ;;  %2753 = vmatpush3.bf16.msra.mxu1 %v2979_v35 }
  0x28   : > { %v3326_v0 = vld [vmem:[%s855_s8] sm:$0xff]  ;;  %2746 = vmatprep.subr.bf16.mxu0 %v3113_v13  ;;  %v2977_v29 = vld [vmem:[%s3768_s10 + $0x8] sm:$0xff]   ;;  %2754 = vmatprep.subr.bf16.mxu1 %v3113_v13  ;;  %s3771_s29 = sld [smem:[#allocation21_spill]]  ;;  %s3116_s8 = smov 112  }
  0x29   : > { %v883_v1 = vsel %vm882_vm0, %v3326_v0, 0.0  ;;  %v2978_v32 = vld [vmem:[%s3768_s10] sm:$0xff]   ;;  %s3742_s9 = smov 104   ;;  %s3736_s10 = smov 80  }
  0x2a   : > { %884 = vadd.xlane.f32.xlu0 %v883_v1 }
  0x2b   : > { %2747 = vmatpush3.bf16.msra.mxu0 %v2976_v14  ;;  %2755 = vmatpush3.bf16.msra.mxu1 %v2980_v37 }
  0x2c   : > { %2760 = vmatprep.subr.bf16.mxu0 %v3113_v13  ;;  %v2685_v24 = vld [vmem:[%s3767_s30] ss:$0 sm:$0xff]  ;;  %s3770_s30 = sld [smem:[#allocation13_spill]]  ;;  %2768 = vmatprep.subr.bf16.mxu1 %v3113_v13 }
  0x2e   : > { %1060 = vadd.xlane.f32.xlu0 %v883_v1  ;;  %v2624_v39 = vld [vmem:[%s3771_s29] ss:$0 sm:$0xff]  ;;  %s3738_s29 = sshll.u32 %s3318_s1, 2 }
  0x32   : > { %s859_s0 = scalar_lea.vmem %s3770_s30, %s3769_s7  ;;  %s3737_s30 = smov 96  }
  0x33   : > { %v981_v36 = vld [vmem:[%s859_s0] sm:$0xff]  ;;  %s3772_s0 = sld [smem:[#allocation19_spill]] }
  0x34   : > { %v982_v38 = vpack.c.bf16 %v981_v36, %v981_v36 }
  0x36   : > { %2757 = vmatmul.mubr.msk.bf16.vlgmr.msra.gmra.mxu1 %vm882_vm0, %v982_v38 }
  0x37   : > { %2770 = vmatprep.mubr.msk.bf16.mxu1 %vm3114_vm1, %v3113_v13 }
  0x39   : > { %v2632_v46 = vld [vmem:[%s3772_s0] ss:$0 sm:$0xff]  ;;  %s3773_s0 = sld [smem:[#allocation14_spill]] }
  0x3f   : > { %s866_s7 = scalar_lea.vmem %s3773_s0, %s3738_s29  ;;  %s3735_s0 = smov 72  }
  0x40   : > { %s3741_s29 = smov 8  }
  0xb3   : > { %v885_v2 = vpop.xlane.xlu0 %884 }
  0xb4   : > { %v887_v3 = vmul.f32 0.03125, %v885_v2 }
  0xb6   : > { %v888_v4 = vsub.f32 %v3326_v0, %v887_v3 }
  0xb7   : > { %v1061_v5 = vpop.xlane.xlu0 %1060 }
  0xb8   : > { %v1063_v6 = vmul.f32 0.03125, %v1061_v5  ;;  %v889_v7 = vmul.f32 %v888_v4, %v888_v4 }
  0xba   : > { %v1064_v8 = vsub.f32 %v3326_v0, %v1063_v6  ;;  %v890_v9 = vsel %vm882_vm0, %v889_v7, 0.0 }
  0xbb   : > { %891 = vadd.xlane.f32.xlu1 %v890_v9  ;;  %v1054_v9 = vld [vmem:[%s866_s7] sm:$0xf] }
  0xbc   : > { %v1065_v10 = vmul.f32 %v1064_v8, %v1064_v8 }
  0xbe   : > { %v1066_v11 = vsel %vm882_vm0, %v1065_v10, 0.0  ;;  %v1055_v10 = vunpack.c.l.bf16 %v1054_v9 }
  0xbf   : > { %1067 = vadd.xlane.f32.xlu1 %v1066_v11 }
  0xf6   : > { %v1043_v57 = vpop.f32.mrf.mxu1 }
  0xf7   : > { %v1044_v58 = vadd.f32 %v2628_v56, %v1043_v57 }
  0xf8   : > { %v2758_v59 = vpop.f32.mrf.mxu1 }
  0xf9   : > { %v1049_v60 = vpack.c.bf16 %v1044_v58, %v1044_v58 }
  0xfa   : > { %v1046_v61 = vpop.f32.mrf.mxu1 }
  0xfb   : > { %1050 = vst.msk [vmem:[#allocation3] sm:$0xf] %vm979_vm2, %v1049_v60 }
  0xfc   : > { %v2759_v62 = vpop.f32.mrf.mxu1 }
 0x144   : > { %v892_v15 = vpop.xlane.xlu1 %891 }
 0x145   : > { %v893_v16 = vmul.f32 0.03125, %v892_v15 }
 0x147   : > { %v894_v17 = vadd.f32 1e-05, %v893_v16 }
 0x148   : > { %v1068_v18 = vpop.xlane.xlu1 %1067 }
 0x149   : > { %2995 = vrsqrt.f32 %v894_v17  ;;  %v1069_v19 = vmul.f32 0.03125, %v1068_v18 }
 0x14b   : > { %v1070_v20 = vadd.f32 1e-05, %v1069_v19 }
 0x14d   : > { %2997 = vrsqrt.f32 %v1070_v20 }
 0x156   : > { %v2996_v21 = vpop.eup %2995 }
 0x157   : > { %v896_v23 = vmul.f32 %v2996_v21, %v888_v4 }
 0x159   : > { %v903_v25 = vmul.f32 %v2684_v22, %v896_v23 }
 0x15a   : > { %v2998_v26 = vpop.eup %2997 }
 0x15b   : > { %v910_v27 = vadd.f32 %v2685_v24, %v903_v25  ;;  %v1072_v28 = vmul.f32 %v2998_v26, %v1064_v8 }
 0x15d   : > { %v911_v30 = vpack.c.bf16 %v910_v27, %v910_v27  ;;  %v1079_v31 = vmul.f32 %v2684_v22, %v1072_v28 }
 0x15f   : > { %2749 = vmatmul.mubr.msk.bf16.vlgmr.msra.gmra.mxu0 %vm882_vm0, %v911_v30  ;;  %v1086_v33 = vadd.f32 %v2685_v24, %v1079_v31 }
 0x160   : > { %2761 = vmatpush3.bf16.msra.mxu0 %v2977_v29  ;;  %2764 = vmatprep.mubr.msk.bf16.mxu0 %vm3114_vm1, %v3113_v13 }
 0x161   : > { %2762 = vmatprep.subr.bf16.mxu0 %v3113_v13  ;;  %v1087_v34 = vpack.c.bf16 %v1086_v33, %v1086_v33 }
 0x164   : > { %2763 = vmatpush3.bf16.msra.mxu0 %v2978_v32 }
 0x165   : > { %2774 = vmatprep.subr.bf16.mxu0 %v3113_v13 }
 0x167   : > { %2765 = vmatmul.mubr.msk.bf16.vlgmr.msra.gmra.mxu0 %vm882_vm0, %v1087_v34 }
 0x168   : > { %2776 = vmatprep.mubr.msk.bf16.mxu0 %vm3114_vm1, %v3113_v13 }
 0x21f   : > { %v972_v40 = vpop.f32.mrf.mxu0 }
 0x220   : > { %v973_v41 = vadd.f32 %v2624_v39, %v972_v40 }
 0x221   : > { %v2750_v42 = vpop.f32.mrf.mxu0 }
 0x222   : > { %v978_v43 = vpack.c.bf16 %v973_v41, %v973_v41 }
 0x223   : > { %v975_v44 = vpop.f32.mrf.mxu0 }
 0x224   : > { %980 = vst.msk [vmem:[#allocation2] sm:$0xf] %vm979_vm2, %v978_v43 }
 0x225   : > { %v2751_v45 = vpop.f32.mrf.mxu0 }
 0x227   : > { %v1148_v47 = vpop.f32.mrf.mxu0 }
 0x228   : > { %v1149_v48 = vadd.f32 %v2632_v46, %v1148_v47 }
 0x229   : > { %v2766_v49 = vpop.f32.mrf.mxu0 }
 0x22a   : > { %v1160_v50 = vpack.c.bf16 %v1149_v48, %v1149_v48 }
 0x22b   : > { %v1151_v51 = vpop.f32.mrf.mxu0  ;;  %v1154_v52 = vld [vmem:[#allocation2] sm:$0xf] }
 0x22c   : > { %1273 = vrot.lane.b32.xlu1 %v1160_v50, %s3115_s5  ;;  %v1166_v53 = vsel %vm1161_vm3, %v1154_v52, 0  ;;  %v3393_v54 = vcombine.low %v1154_v52, %v1154_v52 }
 0x22d   : > { %v2767_v55 = vpop.f32.mrf.mxu0  ;;  %2769 = vmatpush3.bf16.xpose.msra.mxu1 %v1166_v53 }
 0x22e   : > { %1275 = vrot.lane.b32.xlu0 %v3393_v54, %s3115_s5  ;;  %2780 = vmatprep.subr.bf16.mxu1 %v3113_v13 }
 0x230   : > { %1385 = vrot.lane.b32.xlu1 %v3393_v54, %s3116_s8 }
 0x232   : > { %1495 = vrot.lane.b32.xlu0 %v3393_v54, %s3742_s9 }
 0x234   : > { %1383 = vrot.lane.b32.xlu1 %v1160_v50, %s3116_s8  ;;  %2771 = vmatmul.mubr.msk.bf16.vlgmr.msra.gmra.mxu1 %vm1161_vm3, %v1160_v50 }
 0x235   : > { %2782 = vmatprep.mubr.msk.bf16.mxu1 %vm3114_vm1, %v3113_v13 }
 0x238   : > { %1493 = vrot.lane.b32.xlu1 %v1160_v50, %s3742_s9  ;;  %s3776_s9 = smov 104  }
 0x29e   : > { %v1274_v63 = vpop.permute.xlu1 %1273 }
 0x2a0   : > { %v1276_v1 = vpop.permute.xlu0 %1275 }
 0x2a1   : > { %v1281_v2 = vsel %vm1161_vm3, %v1276_v1, 0 }
 0x2a2   : > { %2781 = vmatpush3.bf16.xpose.msra.mxu1 %v1281_v2  ;;  %v1386_v3 = vpop.permute.xlu1 %1385 }
 0x2a3   : > { %2792 = vmatprep.subr.bf16.mxu1 %v3113_v13  ;;  %v1391_v4 = vsel %vm1161_vm3, %v1386_v3, 0 }
 0x2a4   : > { %v1496_v5 = vpop.permute.xlu0 %1495 }
 0x2a5   : > { %v1501_v7 = vsel %vm1161_vm3, %v1496_v5, 0 }
 0x2a6   : > { %v1384_v6 = vpop.permute.xlu1 %1383 }
 0x2a9   : > { %2783 = vmatmul.mubr.msk.bf16.vlgmr.msra.gmra.mxu1 %vm1161_vm3, %v1274_v63 }
 0x2aa   : > { %2793 = vmatpush3.bf16.xpose.msra.mxu1 %v1391_v4  ;;  %2794 = vmatprep.mubr.msk.bf16.mxu1 %vm3114_vm1, %v3113_v13  ;;  %v1494_v8 = vpop.permute.xlu1 %1493 }
 0x2ab   : > { %2804 = vmatprep.subr.bf16.mxu1 %v3113_v13 }
 0x2b1   : > { %2795 = vmatmul.mubr.msk.bf16.vlgmr.msra.gmra.mxu1 %vm1161_vm3, %v1384_v6 }
 0x2b2   : > { %2805 = vmatpush3.bf16.xpose.msra.mxu1 %v1501_v7  ;;  %2806 = vmatprep.mubr.msk.bf16.mxu1 %vm3114_vm1, %v3113_v13 }
 0x2b3   : > { %2816 = vmatprep.subr.bf16.mxu1 %v3113_v13 }
 0x2b9   : > { %2807 = vmatmul.mubr.msk.bf16.vlgmr.msra.gmra.mxu1 %vm1161_vm3, %v1494_v8 }
 0x2ba   : > { %2820 = vmatprep.mubr.msk.bf16.mxu1 %vm3114_vm1, %v3113_v13 }
 0x2f4   : > { %v1202_v11 = vpop.f32.mrf.mxu1 }
 0x2f5   : > { %v1203_v12 = vadd.f32 %v1202_v11, %v1055_v10 }
 0x2f6   : > { %v2772_v14 = vpop.f32.mrf.mxu1 }
 0x2f7   : > { %v1208_v15 = vsel %vm1161_vm3, %v1203_v12, -inf }
 0x2f8   : > { %1209 = vmax.xlane.f32.xlu0 %v1208_v15  ;;  %v1205_v16 = vpop.f32.mrf.mxu1 }
 0x2fa   : > { %v2773_v17 = vpop.f32.mrf.mxu1 }
 0x369   : > { %v1317_v18 = vpop.f32.mrf.mxu1 }
 0x36a   : > { %v1318_v19 = vadd.f32 %v1317_v18, %v1055_v10 }
 0x36b   : > { %v2784_v20 = vpop.f32.mrf.mxu1 }
 0x36c   : > { %v1323_v21 = vsel %vm1161_vm3, %v1318_v19, -inf }
 0x36d   : > { %1324 = vmax.xlane.f32.xlu1 %v1323_v21  ;;  %v1320_v22 = vpop.f32.mrf.mxu1 }
 0x36f   : > { %v2785_v23 = vpop.f32.mrf.mxu1 }
 0x371   : > { %v1427_v24 = vpop.f32.mrf.mxu1 }
 0x372   : > { %v1428_v25 = vadd.f32 %v1427_v24, %v1055_v10 }
 0x373   : > { %v2796_v26 = vpop.f32.mrf.mxu1 }
 0x374   : > { %v1433_v27 = vsel %vm1161_vm3, %v1428_v25, -inf }
 0x375   : > { %1434 = vmax.xlane.f32.xlu0 %v1433_v27  ;;  %v1430_v28 = vpop.f32.mrf.mxu1 }
 0x377   : > { %v2797_v29 = vpop.f32.mrf.mxu1 }
 0x379   : > { %v1537_v30 = vpop.f32.mrf.mxu1 }
 0x37a   : > { %v1538_v31 = vadd.f32 %v1537_v30, %v1055_v10 }
 0x37b   : > { %v2808_v32 = vpop.f32.mrf.mxu1 }
 0x37c   : > { %v1543_v33 = vsel %vm1161_vm3, %v1538_v31, -inf }
 0x37d   : > { %1544 = vmax.xlane.f32.xlu0 %v1543_v33  ;;  %v1540_v34 = vpop.f32.mrf.mxu1 }
 0x37f   : > { %v2809_v35 = vpop.f32.mrf.mxu1 }
 0x381   : > { %v1210_v36 = vpop.xlane.xlu0 %1209 }
 0x382   : > { %v1211_v37 = vsub.f32 %v1203_v12, %v1210_v36 }
 0x384   : > { %v1212_v38 = vmul.f32 1.442695, %v1211_v37 }
 0x386   : > { %2999 = vpow2.f32 %v1212_v38 }
 0x393   : > { %v3000_v39 = vpop.eup %2999 }
 0x394   : > { %v1214_v40 = vsel %vm1161_vm3, %v3000_v39, 0.0 }
 0x395   : > { %1215 = vadd.xlane.f32.xlu0 %v1214_v40 }
 0x3f6   : > { %v1325_v41 = vpop.xlane.xlu1 %1324 }
 0x3f7   : > { %v1326_v42 = vsub.f32 %v1318_v19, %v1325_v41 }
 0x3f9   : > { %v1327_v43 = vmul.f32 1.442695, %v1326_v42  ;;  %v1779_v42 = vld [vmem:[#allocation3] sm:$0xf] }
 0x3fb   : > { %3001 = vpow2.f32 %v1327_v43 }
 0x3fe   : > { %v1435_v44 = vpop.xlane.xlu0 %1434 }
 0x3ff   : > { %v1436_v45 = vsub.f32 %v1428_v25, %v1435_v44  ;;  %v1790_v44 = vsel %vm1161_vm3, %v1779_v42, 0 }
 0x401   : > { %v1437_v46 = vmul.f32 1.442695, %v1436_v45  ;;  %v2645_v45 = vld [vmem:[%s3775_s11] ss:$0 sm:$0xff] }
 0x403   : > { %3003 = vpow2.f32 %v1437_v46 }
 0x406   : > { %v1545_v51 = vpop.xlane.xlu0 %1544 }
 0x407   : > { %v1546_v52 = vsub.f32 %v1538_v31, %v1545_v51 }
 0x408   : > { %v3002_v47 = vpop.eup %3001 }
 0x409   : > { %v1329_v48 = vsel %vm1161_vm3, %v3002_v47, 0.0  ;;  %v1547_v53 = vmul.f32 1.442695, %v1546_v52 }
 0x40a   : > { %1330 = vadd.xlane.f32.xlu1 %v1329_v48 }
 0x40b   : > { %3005 = vpow2.f32 %v1547_v53 }
 0x410   : > { %v3004_v49 = vpop.eup %3003 }
 0x411   : > { %v1439_v50 = vsel %vm1161_vm3, %v3004_v49, 0.0 }
 0x412   : > { %1440 = vadd.xlane.f32.xlu0 %v1439_v50 }
 0x418   : > { %v3006_v55 = vpop.eup %3005 }
 0x419   : > { %v1549_v56 = vsel %vm1161_vm3, %v3006_v55, 0.0 }
 0x41b   : > { %1335 = vrot.lane.b32.xlu1 %v3393_v54, %s3734_s6  ;;  %s3740_s6 = smov 16  }
 0x41e   : > { %v1216_v57 = vpop.xlane.xlu0 %1215 }
 0x41f   : > { %1445 = vrot.lane.b32.xlu1 %v3393_v54, %s3736_s10  ;;  %3007 = vrcp.f32 %v1216_v57  ;;  %s3739_s10 = smov 24  }
 0x428   : > { %1223 = vrot.lane.b32.xlu0 %v3393_v54, %s3737_s30  ;;  %s3778_s30 = sld [smem:[#allocation15_spill]] }
 0x42c   : > { %v3008_v59 = vpop.eup %3007 }
 0x42d   : > { %v1218_v61 = vmul.f32 %v3008_v59, %v3000_v39  ;;  %v3497_v59 = vcombine.low %v1779_v42, %v1779_v42 }
 0x42f   : > { %v1219_v2 = vpack.c.bf16 %v1218_v61, %v1218_v61 }
 0x443   : > { %1550 = vadd.xlane.f32.xlu1 %v1549_v56 }
 0x454   : > { %1555 = vrot.lane.b32.xlu1 %v3393_v54, %s3735_s0  ;;  %s3774_s0 = sld [smem:[#allocation22_spill]] }
 0x45a   : > { %v2982_v21 = vld [vmem:[%s3774_s0 + $0x8] sm:$0xff]   ;;  %v2983_v23 = vld [vmem:[%s3774_s0] sm:$0xff]  }
 0x45b   : > { %2817 = vmatpush3.bf16.msra.mxu1 %v2982_v21 }
 0x45c   : > { %2818 = vmatprep.subr.bf16.mxu1 %v3113_v13 }
 0x45f   : > { %2819 = vmatpush3.bf16.msra.mxu1 %v2983_v23 }
 0x460   : > { %2832 = vmatprep.subr.bf16.mxu1 %v3113_v13 }
 0x493   : > { %v1331_v58 = vpop.xlane.xlu1 %1330 }
 0x494   : > { %3009 = vrcp.f32 %v1331_v58 }
 0x497   : > { %v1336_v1 = vpop.permute.xlu1 %1335 }
 0x498   : > { %v1341_v54 = vsel %vm1228_vm4, %v1336_v1, 0 }
 0x49b   : > { %v1441_v60 = vpop.xlane.xlu0 %1440  ;;  %v1446_v5 = vpop.permute.xlu1 %1445 }
 0x49c   : > { %3011 = vrcp.f32 %v1441_v60  ;;  %v1451_v8 = vsel %vm1228_vm4, %v1446_v5, 0  ;;  %v2986_v60 = vld [vmem:[%s3711_s14] sm:$0xff]  }
 0x49f   : > { %v1224_v62 = vpop.permute.xlu0 %1223 }
 0x4a0   : > { %v1230_v63 = vsel %vm1228_vm4, %v1224_v62, 0 }
 0x4a1   : > { %2775 = vmatpush3.bf16.msra.mxu0 %v1230_v63  ;;  %v3010_v3 = vpop.eup %3009 }
 0x4a2   : > { %2786 = vmatprep.subr.bf16.mxu0 %v3113_v13  ;;  %v1333_v4 = vmul.f32 %v3010_v3, %v3002_v47 }
 0x4a4   : > { %2777 = vmatmul.mubr.msk.bf16.vlgmr.msra.gmra.mxu0 %vm1161_vm3, %v1219_v2  ;;  %v1334_v6 = vpack.c.bf16 %v1333_v4, %v1333_v4  ;;  %v2649_v2 = vld [vmem:[%s3709_s12] ss:$0 sm:$0xff] }
 0x4a5   : > { %2787 = vmatpush3.bf16.msra.mxu0 %v1341_v54  ;;  %2788 = vmatprep.mubr.msk.bf16.mxu0 %vm3114_vm1, %v3113_v13  ;;  %v2650_v54 = vld [vmem:[%s3710_s13] ss:$0 sm:$0xff] }
 0x4a6   : > { %2798 = vmatprep.subr.bf16.mxu0 %v3113_v13 }
 0x4a9   : > { %v3012_v7 = vpop.eup %3011 }
 0x4aa   : > { %v1443_v9 = vmul.f32 %v3012_v7, %v3004_v49  ;;  %v2651_v7 = vld [vmem:[%s3712_s15] ss:$0 sm:$0xff] }
 0x4ac   : > { %2789 = vmatmul.mubr.msk.bf16.vlgmr.msra.gmra.mxu0 %vm1161_vm3, %v1334_v6  ;;  %v1444_v10 = vpack.c.bf16 %v1443_v9, %v1443_v9 }
 0x4ad   : > { %2799 = vmatpush3.bf16.msra.mxu0 %v1451_v8  ;;  %2800 = vmatprep.mubr.msk.bf16.mxu0 %vm3114_vm1, %v3113_v13 }
 0x4ae   : > { %2810 = vmatprep.subr.bf16.mxu0 %v3113_v13 }
 0x4b4   : > { %2801 = vmatmul.mubr.msk.bf16.vlgmr.msra.gmra.mxu0 %vm1161_vm3, %v1444_v10 }
 0x4b5   : > { %2812 = vmatprep.mubr.msk.bf16.mxu0 %vm3114_vm1, %v3113_v13 }
 0x4cc   : > { %v1551_v11 = vpop.xlane.xlu1 %1550 }
 0x4cd   : > { %3013 = vrcp.f32 %v1551_v11 }
 0x4d0   : > { %v1556_v12 = vpop.permute.xlu1 %1555 }
 0x4d1   : > { %v1561_v14 = vsel %vm1228_vm4, %v1556_v12, 0 }
 0x4d2   : > { %2811 = vmatpush3.bf16.msra.mxu0 %v1561_v14 }
 0x4d3   : > { %2824 = vmatprep.subr.bf16.mxu0 %v3113_v13 }
 0x4da   : > { %v3014_v15 = vpop.eup %3013 }
 0x4db   : > { %v1553_v16 = vmul.f32 %v3014_v15, %v3006_v55 }
 0x4dd   : > { %v1554_v17 = vpack.c.bf16 %v1553_v16, %v1553_v16 }
 0x4df   : > { %2813 = vmatmul.mubr.msk.bf16.vlgmr.msra.gmra.mxu0 %vm1161_vm3, %v1554_v17 }
 0x4e0   : > { %2828 = vmatprep.mubr.msk.bf16.mxu0 %vm3114_vm1, %v3113_v13 }
 0x564   : > { %v1266_v18 = vpop.f32.mrf.mxu0 }
 0x566   : > { %v2778_v19 = vpop.f32.mrf.mxu0 }
 0x568   : > { %v1269_v20 = vpop.f32.mrf.mxu0 }
 0x56a   : > { %v2779_v22 = vpop.f32.mrf.mxu0 }
 0x56c   : > { %v1377_v24 = vpop.f32.mrf.mxu0 }
 0x56d   : > { %1604 = vrot.lane.b32.xlu0 %v1377_v24, %s3741_s29  ;;  %s3783_s29 = smov 8  }
 0x56e   : > { %v2790_v25 = vpop.f32.mrf.mxu0 }
 0x570   : > { %v1380_v26 = vpop.f32.mrf.mxu0 }
 0x572   : > { %v2791_v27 = vpop.f32.mrf.mxu0 }
 0x574   : > { %v1487_v28 = vpop.f32.mrf.mxu0 }
 0x575   : > { %1608 = vrot.lane.b32.xlu1 %v1487_v28, %s3740_s6  ;;  %s3780_s6 = smov 80  }
 0x576   : > { %v2802_v29 = vpop.f32.mrf.mxu0 }
 0x578   : > { %v1490_v30 = vpop.f32.mrf.mxu0 }
 0x57a   : > { %v2803_v31 = vpop.f32.mrf.mxu0 }
 0x59f   : > { %v1597_v32 = vpop.f32.mrf.mxu0 }
 0x5a0   : > { %1612 = vrot.lane.b32.xlu0 %v1597_v32, %s3739_s10  ;;  %s3781_s10 = smov 72  }
 0x5a1   : > { %v2814_v33 = vpop.f32.mrf.mxu0 }
 0x5a3   : > { %v1600_v34 = vpop.f32.mrf.mxu0 }
 0x5a5   : > { %v2815_v35 = vpop.f32.mrf.mxu0 }
 0x5df   : > { %v1605_v36 = vpop.permute.xlu0 %1604 }
 0x5e0   : > { %v1615_v38 = vsel %vm1161_vm3, %v1266_v18, %v1605_v36 }
 0x5e7   : > { %v1609_v37 = vpop.permute.xlu1 %1608 }
 0x5e8   : > { %v1617_v39 = vsel %vm1616_vm5, %v1615_v38, %v1609_v37 }
 0x612   : > { %v1613_v40 = vpop.permute.xlu0 %1612 }
 0x613   : > { %v1619_v41 = vsel %vm1618_vm6, %v1617_v39, %v1613_v40 }
 0x614   : > { %v1620_v43 = vpack.c.bf16 %v1619_v41, %v1619_v41 }
 0x616   : > { %2821 = vmatmul.mubr.msk.bf16.vlgmr.msra.gmra.mxu1 %vm882_vm0, %v1620_v43 }
 0x617   : > { %2833 = vmatpush3.bf16.xpose.msra.mxu1 %v1790_v44  ;;  %2834 = vmatprep.mubr.msk.bf16.mxu1 %vm3114_vm1, %v3113_v13 }
 0x618   : > { %2844 = vmatprep.subr.bf16.mxu1 %v3113_v13 }
 0x6d6   : > { %v1676_v46 = vpop.f32.mrf.mxu1 }
 0x6d7   : > { %v1677_v47 = vadd.f32 %v2645_v45, %v1676_v46 }
 0x6d8   : > { %v2822_v48 = vpop.f32.mrf.mxu1 }
 0x6d9   : > { %v3491_v49 = vadd.f32 %v1677_v47, %v3326_v0  ;;  %v2985_v0 = vld [vmem:[%s3711_s14 + $0x8] sm:$0xff]  }
 0x6da   : > { %v1679_v50 = vpop.f32.mrf.mxu1  ;;  %2825 = vmatpush3.bf16.msra.mxu0 %v2985_v0 }
 0x6db   : > { %v1685_v51 = vsel %vm882_vm0, %v3491_v49, 0.0  ;;  %2826 = vmatprep.subr.bf16.mxu0 %v3113_v13 }
 0x6dc   : > { %1686 = vadd.xlane.f32.xlu1 %v1685_v51  ;;  %v2823_v52 = vpop.f32.mrf.mxu1 }
 0x6de   : > { %2827 = vmatpush3.bf16.msra.mxu0 %v2986_v60 }
 0x6df   : > { %2838 = vmatprep.subr.bf16.mxu0 %v3113_v13 }
 0x765   : > { %v1687_v53 = vpop.xlane.xlu1 %1686 }
 0x766   : > { %v1688_v55 = vmul.f32 0.03125, %v1687_v53 }
 0x768   : > { %v1689_v56 = vsub.f32 %v3491_v49, %v1688_v55 }
 0x76a   : > { %v1690_v57 = vmul.f32 %v1689_v56, %v1689_v56 }
 0x76c   : > { %v1691_v58 = vsel %vm882_vm0, %v1690_v57, 0.0 }
 0x76d   : > { %1692 = vadd.xlane.f32.xlu0 %v1691_v58 }
 0x783   : > { %1898 = vrot.lane.b32.xlu0 %v3497_v59, %s3115_s5 }
 0x7f6   : > { %v1693_v61 = vpop.xlane.xlu0 %1692 }
 0x7f7   : > { %v1694_v62 = vmul.f32 0.03125, %v1693_v61 }
 0x7f9   : > { %v1695_v63 = vadd.f32 1e-05, %v1694_v62 }
 0x7fa   : > { %v1899_v11 = vpop.permute.xlu0 %1898 }
 0x7fb   : > { %3015 = vrsqrt.f32 %v1695_v63  ;;  %v1904_v15 = vsel %vm1161_vm3, %v1899_v11, 0 }
 0x808   : > { %v3016_v1 = vpop.eup %3015 }
 0x809   : > { %v1697_v3 = vmul.f32 %v3016_v1, %v1689_v56 }
 0x80b   : > { %v1704_v4 = vmul.f32 %v2649_v2, %v1697_v3 }
 0x80d   : > { %v1711_v5 = vadd.f32 %v2650_v54, %v1704_v4 }
 0x80f   : > { %v1712_v6 = vpack.c.bf16 %v1711_v5, %v1711_v5 }
 0x811   : > { %2829 = vmatmul.mubr.msk.bf16.vlgmr.msra.gmra.mxu0 %vm882_vm0, %v1712_v6 }
 0x812   : > { %2840 = vmatprep.mubr.msk.bf16.mxu0 %vm3114_vm1, %v3113_v13 }
 0x8d1   : > { %v1773_v8 = vpop.f32.mrf.mxu0 }
 0x8d2   : > { %v1774_v9 = vadd.f32 %v2651_v7, %v1773_v8 }
 0x8d3   : > { %v2830_v10 = vpop.f32.mrf.mxu0 }
 0x8d4   : > { %v1785_v12 = vpack.c.bf16 %v1774_v9, %v1774_v9 }
 0x8d5   : > { %v1776_v14 = vpop.f32.mrf.mxu0 }
 0x8d6   : > { %2006 = vrot.lane.b32.xlu0 %v1785_v12, %s3116_s8  ;;  %1896 = vrot.lane.b32.xlu1 %v1785_v12, %s3115_s5  ;;  %s3777_s5 = sshll.u32 %s3318_s1, 2  ;;  %s3779_s1 = smov 96  }
 0x8d7   : > { %2835 = vmatmul.mubr.msk.bf16.vlgmr.msra.gmra.mxu1 %vm1161_vm3, %v1785_v12  ;;  %v2831_v16 = vpop.f32.mrf.mxu0  ;;  %s873_s7 = scalar_lea.vmem %s3778_s30, %s3777_s5  ;;  %s849_s5 = sand.u32 1, %s3095_s3  }
 0x8d8   : > { %2845 = vmatpush3.bf16.xpose.msra.mxu1 %v1904_v15  ;;  %2846 = vmatprep.mubr.msk.bf16.mxu1 %vm3114_vm1, %v3113_v13  ;;  %v1056_v24 = vld [vmem:[%s873_s7] sm:$0xf]  ;;  %s2681_s7 = sshll.u32 %s3103_s28, 7  ;;  %s2488_s28 = scalar_lea.sflag [#allocation5], %s849_s5 }
 0x8d9   : > { %2856 = vmatprep.subr.bf16.mxu1 %v3113_v13  ;;  %v1057_v25 = vunpack.c.l.bf16 %v1056_v24  ;;  %s3650_s0 = scalar_lea.hbm %s3723_s26, %s2681_s7 }
 0x8da   : > { %2116 = vrot.lane.b32.xlu0 %v1785_v12, %s3776_s9  ;;  %2008 = vrot.lane.b32.xlu1 %v3497_v59, %s3116_s8  ;;  %s2619_s8 = sshll.u32 %s849_s5, 3 }
 0x8de   : > { %2118 = vrot.lane.b32.xlu1 %v3497_v59, %s3776_s9  ;;  %s3782_s9 = smov 88  }
 0x948   : > { %v1897_v17 = vpop.permute.xlu1 %1896  ;;  %v2007_v21 = vpop.permute.xlu0 %2006 }
 0x949   : > { %2847 = vmatmul.mubr.msk.bf16.vlgmr.msra.gmra.mxu1 %vm1161_vm3, %v1897_v17 }
 0x94a   : > { %2858 = vmatprep.mubr.msk.bf16.mxu1 %vm3114_vm1, %v3113_v13 }
 0x94c   : > { %v2009_v18 = vpop.permute.xlu1 %2008  ;;  %v2117_v23 = vpop.permute.xlu0 %2116 }
 0x94d   : > { %v2014_v19 = vsel %vm1161_vm3, %v2009_v18, 0 }
 0x94e   : > { %2857 = vmatpush3.bf16.xpose.msra.mxu1 %v2014_v19 }
 0x94f   : > { %2868 = vmatprep.subr.bf16.mxu1 %v3113_v13 }
 0x950   : > { %v2119_v20 = vpop.permute.xlu1 %2118 }
 0x951   : > { %v2124_v22 = vsel %vm1161_vm3, %v2119_v20, 0 }
 0x955   : > { %2859 = vmatmul.mubr.msk.bf16.vlgmr.msra.gmra.mxu1 %vm1161_vm3, %v2007_v21 }
 0x956   : > { %2869 = vmatpush3.bf16.xpose.msra.mxu1 %v2124_v22  ;;  %2870 = vmatprep.mubr.msk.bf16.mxu1 %vm3114_vm1, %v3113_v13 }
 0x957   : > { %2880 = vmatprep.subr.bf16.mxu1 %v3113_v13 }
 0x95d   : > { %2871 = vmatmul.mubr.msk.bf16.vlgmr.msra.gmra.mxu1 %vm1161_vm3, %v2117_v23 }
 0x95e   : > { %2884 = vmatprep.mubr.msk.bf16.mxu1 %vm3114_vm1, %v3113_v13 }
 0x997   : > { %v1826_v26 = vpop.f32.mrf.mxu1 }
 0x998   : > { %v1827_v27 = vadd.f32 %v1826_v26, %v1057_v25 }
 0x999   : > { %v2836_v28 = vpop.f32.mrf.mxu1 }
 0x99a   : > { %v1832_v29 = vsel %vm1161_vm3, %v1827_v27, -inf }
 0x99b   : > { %1833 = vmax.xlane.f32.xlu1 %v1832_v29  ;;  %v1829_v30 = vpop.f32.mrf.mxu1 }
 0x99d   : > { %v2837_v31 = vpop.f32.mrf.mxu1 }
 0xa09   : > { %v1940_v32 = vpop.f32.mrf.mxu1 }
 0xa0a   : > { %v1941_v33 = vadd.f32 %v1940_v32, %v1057_v25 }
 0xa0b   : > { %v2848_v34 = vpop.f32.mrf.mxu1 }
 0xa0c   : > { %v1946_v35 = vsel %vm1161_vm3, %v1941_v33, -inf }
 0xa0d   : > { %1947 = vmax.xlane.f32.xlu0 %v1946_v35  ;;  %v1943_v36 = vpop.f32.mrf.mxu1 }
 0xa0e   : > { %v2987_v36 = vld [vmem:[%s3715_s18 + $0x8] sm:$0xff]  }
 0xa0f   : > { %v2849_v37 = vpop.f32.mrf.mxu1  ;;  %2881 = vmatpush3.bf16.msra.mxu1 %v2987_v36 }
 0xa10   : > { %2882 = vmatprep.subr.bf16.mxu1 %v3113_v13 }
 0xa15   : > { %v2050_v38 = vpop.f32.mrf.mxu1 }
 0xa16   : > { %v2051_v39 = vadd.f32 %v2050_v38, %v1057_v25 }
 0xa17   : > { %v2860_v40 = vpop.f32.mrf.mxu1 }
 0xa18   : > { %v2056_v41 = vsel %vm1161_vm3, %v2051_v39, -inf  ;;  %v2988_v40 = vld [vmem:[%s3715_s18] sm:$0xff]  }
 0xa19   : > { %2057 = vmax.xlane.f32.xlu0 %v2056_v41  ;;  %v2053_v42 = vpop.f32.mrf.mxu1  ;;  %2883 = vmatpush3.bf16.msra.mxu1 %v2988_v40 }
 0xa1a   : > { %2896 = vmatprep.subr.bf16.mxu1 %v3113_v13 }
 0xa1b   : > { %v2861_v43 = vpop.f32.mrf.mxu1 }
 0xa1d   : > { %v2160_v44 = vpop.f32.mrf.mxu1 }
 0xa1e   : > { %v2161_v45 = vadd.f32 %v2160_v44, %v1057_v25 }
 0xa1f   : > { %v2872_v46 = vpop.f32.mrf.mxu1 }
 0xa20   : > { %v2166_v47 = vsel %vm1161_vm3, %v2161_v45, -inf }
 0xa21   : > { %2167 = vmax.xlane.f32.xlu0 %v2166_v47  ;;  %v2163_v48 = vpop.f32.mrf.mxu1 }
 0xa23   : > { %v2873_v50 = vpop.f32.mrf.mxu1 }
 0xa24   : > { %v1834_v51 = vpop.xlane.xlu1 %1833 }
 0xa25   : > { %v1835_v52 = vsub.f32 %v1827_v27, %v1834_v51 }
 0xa27   : > { %v1836_v53 = vmul.f32 1.442695, %v1835_v52 }
 0xa29   : > { %3017 = vpow2.f32 %v1836_v53 }
 0xa36   : > { %v3018_v55 = vpop.eup %3017 }
 0xa37   : > { %v1838_v56 = vsel %vm1161_vm3, %v3018_v55, 0.0 }
 0xa38   : > { %1839 = vadd.xlane.f32.xlu1 %v1838_v56 }
 0xa49   : > { %1847 = vrot.lane.b32.xlu1 %v3497_v59, %s3779_s1  ;;  %s3784_s1 = smov 16  }
 0xa96   : > { %v1948_v57 = vpop.xlane.xlu0 %1947 }
 0xa97   : > { %v1949_v58 = vsub.f32 %v1941_v33, %v1948_v57 }
 0xa99   : > { %v1950_v0 = vmul.f32 1.442695, %v1949_v58 }
 0xa9b   : > { %3019 = vpow2.f32 %v1950_v0  ;;  %v2664_v0 = vld [vmem:[%s3716_s19] ss:$0 sm:$0xff] }
 0xaa2   : > { %v2058_v60 = vpop.xlane.xlu0 %2057 }
 0xaa3   : > { %v2059_v61 = vsub.f32 %v2051_v39, %v2058_v60 }
 0xaa5   : > { %v2060_v62 = vmul.f32 1.442695, %v2059_v61 }
 0xaa7   : > { %3021 = vpow2.f32 %v2060_v62 }
 0xaa8   : > { %v3020_v63 = vpop.eup %3019 }
 0xaa9   : > { %v1952_v1 = vsel %vm1161_vm3, %v3020_v63, 0.0 }
 0xaaa   : > { %1953 = vadd.xlane.f32.xlu0 %v1952_v1  ;;  %v2168_v2 = vpop.xlane.xlu0 %2167 }
 0xaab   : > { %v2169_v3 = vsub.f32 %v2161_v45, %v2168_v2 }
 0xaad   : > { %v2170_v54 = vmul.f32 1.442695, %v2169_v3 }
 0xaaf   : > { %3023 = vpow2.f32 %v2170_v54 }
 0xab4   : > { %v3022_v4 = vpop.eup %3021 }
 0xab5   : > { %v2062_v5 = vsel %vm1161_vm3, %v3022_v4, 0.0 }
 0xab6   : > { %2063 = vadd.xlane.f32.xlu1 %v2062_v5 }
 0xabc   : > { %v3024_v6 = vpop.eup %3023 }
 0xabd   : > { %v2172_v7 = vsel %vm1161_vm3, %v3024_v6, 0.0 }
 0xabe   : > { %2173 = vadd.xlane.f32.xlu0 %v2172_v7 }
 0xac1   : > { %v1840_v8 = vpop.xlane.xlu1 %1839 }
 0xac2   : > { %3025 = vrcp.f32 %v1840_v8  ;;  %v2989_v8 = vld [vmem:[%s3719_s22 + $0x8] sm:$0xff]  }
 0xac5   : > { %v1848_v9 = vpop.permute.xlu1 %1847 }
 0xac6   : > { %v1853_v10 = vsel %vm1228_vm4, %v1848_v9, 0  ;;  %v2991_v9 = vld [vmem:[%s3721_s24 + $0x18] sm:$0xff]  }
 0xac7   : > { %2839 = vmatpush3.bf16.msra.mxu0 %v1853_v10  ;;  %2068 = vrot.lane.b32.xlu1 %v3497_v59, %s3780_s6  ;;  %s3785_s6 = smov 24   ;;  %v2992_v10 = vld [vmem:[%s3721_s24 + $0x10] sm:$0xff]  }
 0xac8   : > { %2850 = vmatprep.subr.bf16.mxu0 %v3113_v13 }
 0xacb   : > { %2178 = vrot.lane.b32.xlu1 %v3497_v59, %s3781_s10 }
 0xacf   : > { %v3026_v11 = vpop.eup %3025 }
 0xad0   : > { %v1842_v12 = vmul.f32 %v3026_v11, %v3018_v55 }
 0xad2   : > { %v1843_v14 = vpack.c.bf16 %v1842_v12, %v1842_v12 }
 0xad4   : > { %2841 = vmatmul.mubr.msk.bf16.vlgmr.msra.gmra.mxu0 %vm1161_vm3, %v1843_v14  ;;  %1958 = vrot.lane.b32.xlu0 %v3497_v59, %s3782_s9 }
 0xad5   : > { %2852 = vmatprep.mubr.msk.bf16.mxu0 %vm3114_vm1, %v3113_v13 }
 0xb33   : > { %v1954_v15 = vpop.xlane.xlu0 %1953 }
 0xb34   : > { %3027 = vrcp.f32 %v1954_v15 }
 0xb3f   : > { %v2064_v16 = vpop.xlane.xlu1 %2063 }
 0xb40   : > { %3029 = vrcp.f32 %v2064_v16  ;;  %v2668_v16 = vld [vmem:[%s3717_s20] ss:$0 sm:$0xff] }
 0xb41   : > { %v3028_v17 = vpop.eup %3027 }
 0xb42   : > { %v1956_v19 = vmul.f32 %v3028_v17, %v3020_v63 }
 0xb43   : > { %v2069_v22 = vpop.permute.xlu1 %2068 }
 0xb44   : > { %v1957_v23 = vpack.c.bf16 %v1956_v19, %v1956_v19  ;;  %v2074_v24 = vsel %vm1228_vm4, %v2069_v22, 0  ;;  %v2993_v22 = vld [vmem:[%s3721_s24 + $0x8] sm:$0xff]  }
 0xb47   : > { %v2174_v18 = vpop.xlane.xlu0 %2173  ;;  %v2179_v26 = vpop.permute.xlu1 %2178 }
 0xb48   : > { %3031 = vrcp.f32 %v2174_v18  ;;  %v2184_v29 = vsel %vm1228_vm4, %v2179_v26, 0  ;;  %v2669_v18 = vld [vmem:[%s3718_s21] ss:$0 sm:$0xff] }
 0xb4b   : > { %v1959_v20 = vpop.permute.xlu0 %1958 }
 0xb4c   : > { %v1964_v21 = vsel %vm1228_vm4, %v1959_v20, 0 }
 0xb4d   : > { %2851 = vmatpush3.bf16.msra.mxu0 %v1964_v21  ;;  %v3030_v59 = vpop.eup %3029 }
 0xb4e   : > { %2862 = vmatprep.subr.bf16.mxu0 %v3113_v13  ;;  %v2066_v25 = vmul.f32 %v3030_v59, %v3022_v4  ;;  %v2670_v59 = vld [vmem:[%s3720_s23] ss:$0 sm:$0xff] }
 0xb50   : > { %2853 = vmatmul.mubr.msk.bf16.vlgmr.msra.gmra.mxu0 %vm1161_vm3, %v1957_v23  ;;  %v2067_v27 = vpack.c.bf16 %v2066_v25, %v2066_v25  ;;  %v2994_v23 = vld [vmem:[%s3721_s24] sm:$0xff]  }
 0xb51   : > { %2863 = vmatpush3.bf16.msra.mxu0 %v2074_v24  ;;  %2864 = vmatprep.mubr.msk.bf16.mxu0 %vm3114_vm1, %v3113_v13 }
 0xb52   : > { %2874 = vmatprep.subr.bf16.mxu0 %v3113_v13 }
 0xb55   : > { %v3032_v28 = vpop.eup %3031 }
 0xb56   : > { %v2176_v30 = vmul.f32 %v3032_v28, %v3024_v6 }
 0xb58   : > { %2865 = vmatmul.mubr.msk.bf16.vlgmr.msra.gmra.mxu0 %vm1161_vm3, %v2067_v27  ;;  %v2177_v31 = vpack.c.bf16 %v2176_v30, %v2176_v30 }
 0xb59   : > { %2875 = vmatpush3.bf16.msra.mxu0 %v2184_v29  ;;  %2876 = vmatprep.mubr.msk.bf16.mxu0 %vm3114_vm1, %v3113_v13 }
 0xb5a   : > { %2888 = vmatprep.subr.bf16.mxu0 %v3113_v13 }
 0xb60   : > { %2877 = vmatmul.mubr.msk.bf16.vlgmr.msra.gmra.mxu0 %vm1161_vm3, %v2177_v31 }
 0xb61   : > { %2892 = vmatprep.mubr.msk.bf16.mxu0 %vm3114_vm1, %v3113_v13  ;;  %2889 = vmatpush3.bf16.msra.mxu0 %v2989_v8 }
 0xb62   : > { %2890 = vmatprep.subr.bf16.mxu0 %v3113_v13 }
 0xb94   : > { %v1889_v32 = vpop.f32.mrf.mxu0 }
 0xb96   : > { %v2842_v33 = vpop.f32.mrf.mxu0 }
 0xb98   : > { %v1892_v34 = vpop.f32.mrf.mxu0 }
 0xb9a   : > { %v2843_v35 = vpop.f32.mrf.mxu0 }
 0xc10   : > { %v2000_v37 = vpop.f32.mrf.mxu0 }
 0xc11   : > { %2227 = vrot.lane.b32.xlu1 %v2000_v37, %s3783_s29  ;;  %s3125_s29 = smov [#allocation4]  }
 0xc12   : > { %v2854_v38 = vpop.f32.mrf.mxu0  ;;  %s3039_s30 = sshll.u32 %s3125_s29, 4  ;;  %s3040_s30 = int_to_ptr.vmem [resolvable:$false] %s3039_s30 }
 0xc13   : > { %s3041_s7 = scalar_lea.vmem %s3040_s30, 256 }
 0xc14   : > { %v2003_v39 = vpop.f32.mrf.mxu0 }
 0xc16   : > { %v2855_v41 = vpop.f32.mrf.mxu0 }
 0xc18   : > { %v2110_v42 = vpop.f32.mrf.mxu0 }
 0xc19   : > { %2231 = vrot.lane.b32.xlu0 %v2110_v42, %s3784_s1  ;;  %s851_s1 = scalar_lea.vmem [#allocation4], %s2619_s8 }
 0xc1a   : > { %v2866_v43 = vpop.f32.mrf.mxu0 }
 0xc1c   : > { %v2113_v44 = vpop.f32.mrf.mxu0 }
 0xc1e   : > { %v2867_v45 = vpop.f32.mrf.mxu0 }
 0xc20   : > { %v2220_v46 = vpop.f32.mrf.mxu0 }
 0xc21   : > { %2235 = vrot.lane.b32.xlu1 %v2220_v46, %s3785_s6  ;;  %s2502_s6 = sshll.u32 %s851_s1, 4  ;;  %s3652_s6 = int_to_ptr.vmem [resolvable:$true] %s2502_s6 }
 0xc22   : > { %v2878_v47 = vpop.f32.mrf.mxu0  ;;  %s3035_s8 = scalar_lea.vmem %s3652_s6, 128  ;;  %p3042_p1 = scmp.lt.s32.totalorder %s3652_s6, %s3040_s30 }
 0xc23   : > { %p3036_p12 = scmp.ne.s32.totalorder %s3652_s6, %s3035_s8  ;;  %p3043_p2 = scmp.lt.s32.totalorder %s3041_s7, %s3035_s8 }
 0xc24   : > { %v2223_v48 = vpop.f32.mrf.mxu0 }
 0xc25   : > { %p3037_p13 = pnand %p3036_p12, %p3301_p4  ;;  %p3044_p3 = por %p3043_p2, %p3042_p1 }
 0xc26   : > { %v2879_v50 = vpop.f32.mrf.mxu0 }
 0xc27   : > { %p3038_p0 = pneg %p3037_p13 }
 0xc29   : > { %p3045_p5 = pnand %p3044_p3, %p3038_p0 }
 0xc83   : > { %v2228_v51 = vpop.permute.xlu1 %2227 }
 0xc84   : > { %v2238_v53 = vsel %vm1161_vm3, %v1889_v32, %v2228_v51 }
 0xc8b   : > { %v2232_v52 = vpop.permute.xlu0 %2231 }
 0xc8c   : > { %v2239_v55 = vsel %vm1616_vm5, %v2238_v53, %v2232_v52 }
 0xc93   : > { %v2236_v56 = vpop.permute.xlu1 %2235 }
 0xc94   : > { %v2240_v57 = vsel %vm1618_vm6, %v2239_v55, %v2236_v56 }
 0xc95   : > { %v2241_v58 = vpack.c.bf16 %v2240_v57, %v2240_v57 }
 0xc97   : > { %2885 = vmatmul.mubr.msk.bf16.vlgmr.msra.gmra.mxu1 %vm882_vm0, %v2241_v58 }
 0xc98   : > { %2904 = vmatprep.mubr.msk.bf16.mxu1 %vm3114_vm1, %v3113_v13  ;;  %2897 = vmatpush3.bf16.msra.mxu1 %v2991_v9 }
 0xc99   : > { %2898 = vmatprep.subr.bf16.mxu1 %v3113_v13 }
 0xc9c   : > { %2899 = vmatpush3.bf16.msra.mxu1 %v2992_v10 }
 0xc9d   : > { %2900 = vmatprep.subr.bf16.mxu1 %v3113_v13 }
 0xca0   : > { %2901 = vmatpush3.bf16.msra.mxu1 %v2993_v22 }
 0xca1   : > { %2902 = vmatprep.subr.bf16.mxu1 %v3113_v13  ;;  %v2674_v13 = vld [vmem:[%s3722_s25] ss:$0 sm:$0xff] }
 0xca4   : > { %2903 = vmatpush3.bf16.msra.mxu1 %v2994_v23 }
 0xd57   : > { %v2297_v60 = vpop.f32.mrf.mxu1 }
 0xd58   : > { %v2298_v61 = vadd.f32 %v2664_v0, %v2297_v60 }
 0xd59   : > { %v2886_v62 = vpop.f32.mrf.mxu1 }
 0xd5a   : > { %v2303_v63 = vadd.f32 %v2298_v61, %v3491_v49  ;;  %v2990_v49 = vld [vmem:[%s3719_s22] sm:$0xff]  }
 0xd5b   : > { %v2300_v1 = vpop.f32.mrf.mxu1  ;;  %2891 = vmatpush3.bf16.msra.mxu0 %v2990_v49 }
 0xd5c   : > { %v2306_v2 = vsel %vm882_vm0, %v2303_v63, 0.0 }
 0xd5d   : > { %2307 = vadd.xlane.f32.xlu0 %v2306_v2  ;;  %v2887_v3 = vpop.f32.mrf.mxu1 }
 0xde6   : > { %v2308_v54 = vpop.xlane.xlu0 %2307 }
 0xde7   : > { %v2309_v4 = vmul.f32 0.03125, %v2308_v54 }
 0xde9   : > { %v2310_v5 = vsub.f32 %v2303_v63, %v2309_v4 }
 0xdeb   : > { %v2311_v6 = vmul.f32 %v2310_v5, %v2310_v5 }
 0xded   : > { %v2312_v7 = vsel %vm882_vm0, %v2311_v6, 0.0 }
 0xdee   : > { %2313 = vadd.xlane.f32.xlu1 %v2312_v7 }
 0xe77   : > { %v2314_v11 = vpop.xlane.xlu1 %2313 }
 0xe78   : > { %v2315_v12 = vmul.f32 0.03125, %v2314_v11 }
 0xe7a   : > { %v2316_v14 = vadd.f32 1e-05, %v2315_v12 }
 0xe7c   : > { %3033 = vrsqrt.f32 %v2316_v14 }
 0xe89   : > { %v3034_v15 = vpop.eup %3033 }
 0xe8a   : > { %v2318_v17 = vmul.f32 %v3034_v15, %v2310_v5 }
 0xe8c   : > { %v2325_v19 = vmul.f32 %v2668_v16, %v2318_v17 }
 0xe8e   : > { %v2332_v20 = vadd.f32 %v2669_v18, %v2325_v19 }
 0xe90   : > { %v2333_v21 = vpack.c.bf16 %v2332_v20, %v2332_v20 }
 0xe92   : > { %2893 = vmatmul.mubr.msk.bf16.vlgmr.msra.gmra.mxu0 %vm882_vm0, %v2333_v21 }
 0xf52   : > { %v2394_v24 = vpop.f32.mrf.mxu0 }
 0xf53   : > { %v2395_v25 = vadd.f32 %v2670_v59, %v2394_v24 }
 0xf54   : > { %v2894_v26 = vpop.f32.mrf.mxu0 }
 0xf55   : > { %v2400_v27 = vmax.f32 %v2395_v25, 0.0 }
 0xf56   : > { %v2397_v28 = vpop.f32.mrf.mxu0 }
 0xf57   : > { %v2401_v29 = vpack.c.bf16 %v2400_v27, %v2400_v27 }
 0xf58   : > { %v2895_v30 = vpop.f32.mrf.mxu0 }
 0xf59   : > { %2905 = vmatmul.mubr.msk.bf16.vlgmr.msra.gmra.mxu1 %vm2441_vm7, %v2401_v29 }
0x1019   : > { %v2479_v31 = vpop.f32.mrf.mxu1 }
0x101a   : > { %v2480_v32 = vadd.f32 %v2674_v13, %v2479_v31 }
0x101b   : > { %v2906_v33 = vpop.f32.mrf.mxu1 }
0x101c   : > { %v2485_v34 = vadd.f32 %v2480_v32, %v2303_v63 }
0x101d   : > { %v2482_v35 = vpop.f32.mrf.mxu1 }
0x101e   : > { %2486 = vst.msk [vmem:[%s851_s1] sm:$0xff] %vm882_vm0, %v2485_v34 }
0x101f   : > { %v2907_v36 = vpop.f32.mrf.mxu1 }
0x1020   : > { %3048 = shalt.err (!%p3045_p5)
}
0x1021   : > { %s3049_s1 = scalar_lea.hbm %s3650_s0, 128  ;;  %s3053_s9 = scalar_lea.hbm %s3723_s26, 256 }
0x1022   : > { %p3050_p6 = scmp.ne.s32.totalorder %s3650_s0, %s3049_s1  ;;  %p3054_p10 = scmp.lt.s32.totalorder %s3650_s0, %s3723_s26 }
0x1023   : > { %p3055_p11 = scmp.lt.s32.totalorder %s3053_s9, %s3049_s1 }
0x1024   : > { %p3051_p7 = pnand %p3050_p6, %p3301_p4 }
0x1025   : > { %p3056_p12 = por %p3055_p11, %p3054_p10 }
0x1026   : > { %p3052_p9 = pneg %p3051_p7 }
0x1028   : > { %p3057_p13 = pnand %p3056_p12, %p3052_p9 }
0x102a   : > { %3060 = shalt.err (!%p3057_p13)
}
0x102b   : > { %2908 = dma.vmem_to_hbm [thread:$0]  (%p3301_p4), %s3652_s6, 128, %s3650_s0, %s2488_s28  }
0x102c PF: > { %p2914_p0 = scmp.ge.s32.totalorder %s3111_s4, 2  ;;  %s2514_s30 = sand.u32 1, %s3091_s27  }
0x102d   : > { %s2515_s11 = scalar_lea.sflag [#allocation5], %s2514_s30 }
0x102e   : > { %p2911_p1 = pnand %p2914_p0, %p3308_p8 }
0x1030   : > { %p2912_p2 = pneg %p2911_p1 }
0x1032   : > { %3086 = dma.done.wait (%p2912_p2), %s2515_s11, 128  }
0x1033   : > { %3088 = vsyncadd (%p2912_p2), %s2515_s11, 4294967168  ;;  %s39_s4 = sadd.s32 1, %s3111_s4   ;;  %s3787_s2 = sld [smem:[#allocation7_spill]] }
0x1034   : > { %p36_p3 = scmp.ge.s32.totalorder %s39_s4, 4   ;;  %s3788_s7 = sld [smem:[#allocation11_spill]] }
0x1035   : > { %s3789_s28 = sld [smem:[#allocation8_spill]]  ;;  %s3791_s27 = smov %s3095_s3 }
0x1036   : > { %s3790_s8 = sld [smem:[#allocation9_spill]]  ;;  %38 = sbr.rel (!%p36_p3) target bundleno = 17 (0x11), region = 173 }
0x1039   : > { %s3792_s3 = smov %s3787_s2 }
0x103b   :  { %2520 = vsyncpa [#allocation5], 1 }
0x103c   :  { %2522 = vsyncpa [#allocation5 + $0x1], 1 }

</bundles_post_ra>
